<compile_context>
chip_gen: v5e
topology: v5e:2x2
jax: 0.10.0
libtpu: 0.0.40
codegen_flags: <defaults>
</compile_context>

<pallas_src>
import jax
import jax.numpy as jnp
import numpy as np
from jax.experimental import pallas as pl
from jax.experimental.pallas import tpu as pltpu


def _round_up(x, m):
    return (x + m - 1) // m * m


def _tpu_vmem_capacity_bytes():
    try:
        return int(pltpu.get_tpu_info().vmem_capacity_bytes)
    except Exception:
        return 64 * 1024 * 1024  # conservative fallback (v7x per-TC VMEM)


_VMEM_CAP = _tpu_vmem_capacity_bytes()
# generation-aware budgets: ~48 MiB scoped / ~16 MiB tile budget on 64 MiB-VMEM
# chips (v7x), ~96 MiB / ~30 MiB on 128 MiB-VMEM chips (v5e/v6e).
_VMEM_LIMIT_BYTES = max(48 << 20, min(int(_VMEM_CAP * 3 // 4), 100 << 20))
_TILE_BUDGET_BYTES = max(14 << 20, min(_VMEM_CAP // 4, 30 << 20))


# ---------------------------------------------------------------------------
# Shared 3x3-conv core (one cout tile)
# ---------------------------------------------------------------------------
def _conv_tile_f32(x, w, W, cout_t):
    """x: (TH+2, Wp, Cin) bf16 halo'd rows; w: (3, Cin, 3*cout_t) packed as
    [kh, ci, kw*cout_t + co].  Returns the (TH, W, cout_t) f32 conv result."""
    THp2, Wp, Cin = x.shape
    TH = THp2 - 2
    # 3 MXU matmuls (one per kh); the 3 kw taps live in the matmul N dimension.
    # Wp is a multiple of 16, so the merge/split reshapes are free re-tilings.
    acc = jnp.dot(x[0:TH].reshape(TH * Wp, Cin), w[0],
                  preferred_element_type=jnp.float32)
    acc = acc + jnp.dot(x[1:1 + TH].reshape(TH * Wp, Cin), w[1],
                        preferred_element_type=jnp.float32)
    acc = acc + jnp.dot(x[2:2 + TH].reshape(TH * Wp, Cin), w[2],
                        preferred_element_type=jnp.float32)
    acc = acc.reshape(TH, Wp, 3 * cout_t)
    # Recombine kw taps with three shifted slice-adds.
    return (acc[:, 0:W, 0 * cout_t:1 * cout_t]
            + acc[:, 1:1 + W, 1 * cout_t:2 * cout_t]
            + acc[:, 2:2 + W, 2 * cout_t:3 * cout_t])


# ---------------------------------------------------------------------------
# Kernel 1: fused 3x3 conv (pad=1, bias) + ReLU
# ---------------------------------------------------------------------------
def _conv3x3_relu_kernel(x_ref, xh_ref, w_ref, b_ref, out_ref):
    """x_ref : (1, TH, Wp, Cin)        main row window of padded input (bf16)
    xh_ref  : (1, 2,  Wp, Cin)         2-row bottom halo (bf16)
    w_ref   : (ncout, 3, Cin, 3*ct)    full packed weights (VMEM-resident)
    b_ref   : (ncout, 1, ct)           conv bias (f32)
    out_ref : (1, TH, W, Cout)"""
    W = out_ref.shape[2]
    ncout = w_ref.shape[0]
    ct = b_ref.shape[2]
    # TODO(synk): replace with a single overlapping-window fetch.
    x = jnp.concatenate([x_ref[0], xh_ref[0]], axis=0)       # (TH+2, Wp, Cin)
    for jt in range(ncout):                                   # static unroll
        y = _conv_tile_f32(x, w_ref[jt], W, ct)
        y = jnp.maximum(y + b_ref[jt].astype(jnp.float32), 0.0)
        out_ref[0, :, :, jt * ct:(jt + 1) * ct] = y.astype(out_ref.dtype)


# ---------------------------------------------------------------------------
# Kernel 2: conv10 + `res` head fused (ConvRelu then 1x1 single-channel conv)
# ---------------------------------------------------------------------------
def _conv3x3_relu_res_kernel(x_ref, xh_ref, w_ref, b_ref, wr_ref, br_ref,
                             out_ref):
    """Same conv core as kernel 1 (single cout tile), followed in the epilogue
    by the 1x1 head: res = sum_c y[..., c] * wr[c] + br.  out_ref: (1, TH, W)."""
    W = out_ref.shape[2]
    ct = b_ref.shape[2]
    x = jnp.concatenate([x_ref[0], xh_ref[0]], axis=0)
    y = _conv_tile_f32(x, w_ref[0], W, ct)
    y = jnp.maximum(y + b_ref[0].astype(jnp.float32), 0.0)    # (TH, W, Cout)
    wr = wr_ref[0].astype(jnp.float32)                         # (Cout,)
    res = jnp.sum(y * wr[None, None, :], axis=-1) + br_ref[0, 0]
    out_ref[0] = res.astype(out_ref.dtype)


# ---------------------------------------------------------------------------
# Host-side helpers
# ---------------------------------------------------------------------------
def _pack_conv_weights(w_oihw, bias, cout_tile):
    """OIHW -> (ncout, kh, Cin, kw*cout_tile + co) bf16 and (ncout, 1, ct) f32."""
    Cout, Cin = w_oihw.shape[0], w_oihw.shape[1]
    ncout = Cout // cout_tile
    w = jnp.transpose(w_oihw, (2, 3, 1, 0))                   # (3, 3, Cin, Cout)
    w = w.reshape(3, 3, Cin, ncout, cout_tile)
    w = jnp.transpose(w, (3, 0, 2, 1, 4))                     # (ncout,kh,Cin,kw,ct)
    w = w.reshape(ncout, 3, Cin, 3 * cout_tile).astype(jnp.bfloat16)
    b = bias.reshape(ncout, 1, cout_tile).astype(jnp.float32)
    return w, b


def _auto_row_tile(H, W, Wp, Cin, Cout, cout_t, out_bytes,
                   budget_bytes=None, max_tile=128, align=2):
    """Largest row tile (multiple of `align`, dividing H) whose streamed
    per-step working set fits the generation-dependent VMEM budget."""
    if budget_bytes is None:
        budget_bytes = _TILE_BUDGET_BYTES
    wts = 2 * 9 * Cin * Cout * 2                 # resident packed weights (x2 bufs)
    stream_budget = max(budget_bytes - wts, budget_bytes // 2)

    def est(th):
        x_tile = (th + 2) * Wp * Cin * 2         # bf16 input window (+halo)
        acc = th * Wp * 3 * cout_t * 4           # packed f32 accumulator
        out_t = th * W * Cout * out_bytes
        y_t = th * W * cout_t * 4
        # double-buffered streamed blocks + halo concat copy + epilogue temps
        return 2 * (x_tile + out_t) + 2 * x_tile + 2 * acc + 3 * y_t

    best = None
    for th in range(align, min(H, max_tile) + 1, align):
        if H % th == 0 and est(th) <= stream_budget:
            best = th
    return best if best is not None else align


def _pad_input(x_nhwc, W):
    """Pad H by 1 top/bottom, W by 1 left and enough right zeros so the padded
    width is a multiple of 16 (free re-tiling for bf16/f32 reshapes); bf16."""
    Wp = _round_up(W + 2, 16)
    xp = jnp.pad(x_nhwc, ((0, 0), (1, 1), (1, Wp - W - 1), (0, 0)))
    return xp.astype(jnp.bfloat16), Wp


# ---------------------------------------------------------------------------
# Public wrappers
# ---------------------------------------------------------------------------
def conv3x3_relu_nhwc(x_nhwc, w_oihw, bias, *, row_tile=None, cout_tile=None,
                      out_dtype=jnp.bfloat16):
    """ConvRelu block: Conv2d(k=3, stride=1, padding=1, bias=True) + ReLU (NHWC)."""
    N, H, W, Cin = x_nhwc.shape
    Cout = w_oihw.shape[0]
    assert w_oihw.shape == (Cout, Cin, 3, 3)
    assert H % 2 == 0, "H must be even (UNet feature maps are powers of two)"

    xp, Wp = _pad_input(x_nhwc, W)

    if cout_tile is None:
        cout_tile = 128 if Cout % 128 == 0 else Cout
    assert Cout % cout_tile == 0
    ncout = Cout // cout_tile
    out_bytes = np.dtype(out_dtype).itemsize

    if row_tile is None:
        align = 8 if H % 8 == 0 else 2
        row_tile = _auto_row_tile(H, W, Wp, Cin, Cout, cout_tile, out_bytes,
                                  align=align)
    assert H % row_tile == 0 and row_tile % 2 == 0
    hb = H // row_tile
    halo_blk = row_tile // 2       # halo rows start at (i+1)*row_tile, 2-row blocks

    w, b = _pack_conv_weights(w_oihw, bias, cout_tile)

    out = pl.pallas_call(
        _conv3x3_relu_kernel,
        out_shape=jax.ShapeDtypeStruct((N, H, W, Cout), out_dtype),
        # activations streamed once; full weights/bias have constant block
        # indices so they are DMA'd a single time and stay VMEM-resident.
        grid=(N, hb),
        in_specs=[
            pl.BlockSpec((1, row_tile, Wp, Cin), lambda n, i: (n, i, 0, 0)),
            pl.BlockSpec((1, 2, Wp, Cin),
                         lambda n, i: (n, i * halo_blk + halo_blk, 0, 0)),
            pl.BlockSpec((ncout, 3, Cin, 3 * cout_tile),
                         lambda n, i: (0, 0, 0, 0)),
            pl.BlockSpec((ncout, 1, cout_tile), lambda n, i: (0, 0, 0)),
        ],
        out_specs=pl.BlockSpec((1, row_tile, W, Cout),
                               lambda n, i: (n, i, 0, 0)),
        compiler_params=pltpu.CompilerParams(
            dimension_semantics=("parallel", "parallel"),
            vmem_limit_bytes=_VMEM_LIMIT_BYTES),
    )(xp, xp, w, b)
    return out


def conv3x3_relu_res_head_nhwc(x_nhwc, w_oihw, bias, wr_oihw, rbias, *,
                               row_tile=None, out_dtype=jnp.float32):
    """conv10 + `res` fused: ConvRelu(Cin->Cout) then the 1x1 single-channel
    head, computed in the epilogue so dec10 never hits HBM.  Returns (N, H, W)."""
    N, H, W, Cin = x_nhwc.shape
    Cout = w_oihw.shape[0]
    assert w_oihw.shape == (Cout, Cin, 3, 3)
    assert wr_oihw.shape == (1, Cout, 1, 1)
    assert H % 2 == 0

    xp, Wp = _pad_input(x_nhwc, W)

    cout_tile = Cout              # the head needs all channels in one step
    if row_tile is None:
        row_tile = _auto_row_tile(H, W, Wp, Cin, Cout, cout_tile, 4, align=8)
    assert H % row_tile == 0 and row_tile % 2 == 0
    assert row_tile % 8 == 0 or row_tile == H
    hb = H // row_tile
    halo_blk = row_tile // 2

    w, b = _pack_conv_weights(w_oihw, bias, cout_tile)
    wr = wr_oihw.reshape(1, Cout).astype(jnp.float32)
    br = rbias.reshape(1, 1).astype(jnp.float32)

    out = pl.pallas_call(
        _conv3x3_relu_res_kernel,
        out_shape=jax.ShapeDtypeStruct((N, H, W), out_dtype),
        grid=(N, hb),
        in_specs=[
            pl.BlockSpec((1, row_tile, Wp, Cin), lambda n, i: (n, i, 0, 0)),
            pl.BlockSpec((1, 2, Wp, Cin),
                         lambda n, i: (n, i * halo_blk + halo_blk, 0, 0)),
            pl.BlockSpec((1, 3, Cin, 3 * cout_tile), lambda n, i: (0, 0, 0, 0)),
            pl.BlockSpec((1, 1, cout_tile), lambda n, i: (0, 0, 0)),
            pl.BlockSpec((1, Cout), lambda n, i: (0, 0)),
            pl.BlockSpec((1, 1), lambda n, i: (0, 0)),
        ],
        out_specs=pl.BlockSpec((1, row_tile, W), lambda n, i: (n, i, 0)),
        compiler_params=pltpu.CompilerParams(
            dimension_semantics=("parallel", "parallel"),
            vmem_limit_bytes=_VMEM_LIMIT_BYTES),
    )(xp, xp, w, b, wr, br)
    return out


def conv_relu(x_nchw, w_oihw, bias, *, row_tile=None, cout_tile=None,
              out_dtype=jnp.bfloat16):
    """PyTorch-facing ConvRelu: NCHW in / NCHW out (values are bf16-precision)."""
    x = jnp.transpose(x_nchw, (0, 2, 3, 1))
    y = conv3x3_relu_nhwc(x, w_oihw, bias, row_tile=row_tile,
                          cout_tile=cout_tile, out_dtype=out_dtype)
    return jnp.transpose(y, (0, 3, 1, 2))


def upsample2x_nhwc(x_nhwc):
    """F.interpolate(scale_factor=2, mode='nearest') on NHWC."""
    return jnp.repeat(jnp.repeat(x_nhwc, 2, axis=1), 2, axis=2)


# ---------------------------------------------------------------------------
# Pure-JAX references (NCHW, f32, HIGHEST precision)
# ---------------------------------------------------------------------------
def ref_conv_relu(x, w, b):
    y = jax.lax.conv_general_dilated(
        x.astype(jnp.float32), w.astype(jnp.float32), (1, 1), ((1, 1), (1, 1)),
        dimension_numbers=("NCHW", "OIHW", "NCHW"),
        precision=jax.lax.Precision.HIGHEST)
    return jnp.maximum(y + b[None, :, None, None], 0.0)


def ref_conv1x1(x, w, b):
    y = jax.lax.conv_general_dilated(
        x.astype(jnp.float32), w.astype(jnp.float32), (1, 1), ((0, 0), (0, 0)),
        dimension_numbers=("NCHW", "OIHW", "NCHW"),
        precision=jax.lax.Precision.HIGHEST)
    return y + b[None, :, None, None]


if __name__ == "__main__":
    key = jax.random.PRNGKey(0)
    ks = jax.random.split(key, 10)

    # ---- check 1: single ConvRelu block (NCHW), 2 row tiles + 2 cout tiles ----
    N, Cin, Cout, H, W = 2, 4, 8, 16, 16
    x = jax.random.normal(ks[0], (N, Cin, H, W), jnp.float32)
    w1 = jax.random.normal(ks[1], (Cout, Cin, 3, 3), jnp.float32) * 0.1
    b1 = jax.random.normal(ks[2], (Cout,), jnp.float32) * 0.01

    out1 = jax.block_until_ready(conv_relu(x, w1, b1, row_tile=8, cout_tile=4))
    ref1 = ref_conv_relu(x, w1, b1)
    assert out1.shape == (N, Cout, H, W), out1.shape
    np.testing.assert_allclose(np.asarray(out1.astype(jnp.float32)),
                               np.asarray(ref1), rtol=2e-2, atol=2e-2)

    # ---- check 2: UNet decoder tail, NHWC end-to-end ----
    #   dec = ConvRelu(upsample2x(enc_low))           (conv9-like)
    #   dec = ConvRelu(cat([dec, skip]))              (conv9_2-like)
    #   res = res_head(ConvRelu(upsample2x(dec)))     (conv10 + res, fused)
    Cl, Cs, Cd, Cf = 8, 6, 8, 8
    enc_low = jax.random.normal(ks[3], (N, Cl, H // 2, W // 2), jnp.float32)
    skip = jax.random.normal(ks[4], (N, Cs, H, W), jnp.float32)
    wa = jax.random.normal(ks[5], (Cd, Cl, 3, 3), jnp.float32) * 0.1
    wb = jax.random.normal(ks[6], (Cd, Cd + Cs, 3, 3), jnp.float32) * 0.1
    wc = jax.random.normal(ks[7], (Cf, Cd, 3, 3), jnp.float32) * 0.1
    wr = jax.random.normal(ks[8], (1, Cf, 1, 1), jnp.float32) * 0.1
    ba = jnp.zeros((Cd,), jnp.float32)    # module init zeroes conv biases
    bb = jnp.zeros((Cd,), jnp.float32)
    bc = jnp.zeros((Cf,), jnp.float32)
    br = jnp.zeros((1,), jnp.float32)

    # Pallas decoder tail; NCHW<->NHWC only at the boundary, bf16 between layers.
    low_nhwc = jnp.transpose(enc_low, (0, 2, 3, 1))
    skip_nhwc = jnp.transpose(skip, (0, 2, 3, 1)).astype(jnp.bfloat16)

    dec = conv3x3_relu_nhwc(upsample2x_nhwc(low_nhwc), wa, ba, row_tile=8)
    dec = conv3x3_relu_nhwc(jnp.concatenate([dec, skip_nhwc], axis=-1), wb, bb)
    res_nhw = conv3x3_relu_res_head_nhwc(upsample2x_nhwc(dec), wc, bc, wr, br)
    res = res_nhw[:, None, :, :]                         # NCHW (N, 1, 2H, 2W)
    res = jax.block_until_ready(res)
    outputs = (res, res)   # SeResNext50_Unet_Loc.forward returns the res head twice

    # pure-JAX reference of the same stage (f32 HIGHEST)
    up_r = jnp.repeat(jnp.repeat(enc_low, 2, axis=2), 2, axis=3)
    dec_r = ref_conv_relu(up_r, wa, ba)
    dec_r = ref_conv_relu(jnp.concatenate([dec_r, skip], axis=1), wb, bb)
    dec10_r = ref_conv_relu(jnp.repeat(jnp.repeat(dec_r, 2, axis=2), 2, axis=3),
                            wc, bc)
    res_r = ref_conv1x1(dec10_r, wr, br)
    assert res.shape == (N, 1, 2 * H, 2 * W), res.shape
    # one bf16 3x3 conv deeper than before, so a slightly looser tolerance
    np.testing.assert_allclose(np.asarray(res), np.asarray(res_r),
                               rtol=4e-2, atol=4e-2)

    print("KERNEL_OK")
</pallas_src>

<mosaic_0001>
module attributes {stable_mosaic.version = 11 : i64} {
  func.func @_conv3x3_relu_kernel(%arg0: i32, %arg1: i32, %arg2: memref<1x8x32x4xbf16, #tpu.memory_space<vmem>>, %arg3: memref<1x2x32x4xbf16, #tpu.memory_space<vmem>>, %arg4: memref<2x3x4x12xbf16, #tpu.memory_space<vmem>>, %arg5: memref<2x1x4xf32, #tpu.memory_space<vmem>>, %arg6: memref<1x8x16x8xbf16, #tpu.memory_space<vmem>>) attributes {dimension_semantics = [#tpu.dimension_semantics<parallel>, #tpu.dimension_semantics<parallel>], iteration_bounds = array<i64: 2, 2>, scalar_prefetch = 0 : i64, scratch_operands = 0 : i64, tpu.core_type = #tpu.core_type<tc>, window_params = [{transform_indices = @transform_0, window_bounds = array<i64: 1, 8, 32, 4>}, {transform_indices = @transform_1, window_bounds = array<i64: 1, 2, 32, 4>}, {pipeline_mode = #tpu.pipeline_mode<synchronous>, transform_indices = @transform_2, window_bounds = array<i64: 2, 3, 4, 12>}, {pipeline_mode = #tpu.pipeline_mode<synchronous>, transform_indices = @transform_3, window_bounds = array<i64: 2, 1, 4>}, {transform_indices = @transform_4, window_bounds = array<i64: 1, 8, 16, 8>}]} {
    %c0 = arith.constant 0 : index
    %c0_0 = arith.constant 0 : index
    %c0_1 = arith.constant 0 : index
    %c0_2 = arith.constant 0 : index
    %0 = vector.load %arg2[%c0, %c0_0, %c0_1, %c0_2] : memref<1x8x32x4xbf16, #tpu.memory_space<vmem>>, vector<1x8x32x4xbf16>
    %1 = vector.shape_cast %0 : vector<1x8x32x4xbf16> to vector<8x32x4xbf16>
    %c0_3 = arith.constant 0 : index
    %c0_4 = arith.constant 0 : index
    %c0_5 = arith.constant 0 : index
    %c0_6 = arith.constant 0 : index
    %2 = vector.load %arg3[%c0_3, %c0_4, %c0_5, %c0_6] : memref<1x2x32x4xbf16, #tpu.memory_space<vmem>>, vector<1x2x32x4xbf16>
    %3 = vector.shape_cast %2 : vector<1x2x32x4xbf16> to vector<2x32x4xbf16>
    %4 = tpu.concatenate %1, %3 in 0 : vector<8x32x4xbf16>, vector<2x32x4xbf16> -> vector<10x32x4xbf16>
    %c0_7 = arith.constant 0 : index
    %c0_8 = arith.constant 0 : index
    %c0_9 = arith.constant 0 : index
    %c0_10 = arith.constant 0 : index
    %5 = vector.load %arg4[%c0_7, %c0_8, %c0_9, %c0_10] : memref<2x3x4x12xbf16, #tpu.memory_space<vmem>>, vector<1x3x4x12xbf16>
    %6 = vector.shape_cast %5 : vector<1x3x4x12xbf16> to vector<3x4x12xbf16>
    %7 = vector.extract_strided_slice %4 {offsets = [0, 0, 0], sizes = [8, 32, 4], strides = [1, 1, 1]} : vector<10x32x4xbf16> to vector<8x32x4xbf16>
    %8 = vector.shape_cast %7 : vector<8x32x4xbf16> to vector<256x4xbf16>
    %9 = vector.extract_strided_slice %6 {offsets = [0, 0, 0], sizes = [1, 4, 12], strides = [1, 1, 1]} : vector<3x4x12xbf16> to vector<1x4x12xbf16>
    %10 = vector.shape_cast %9 : vector<1x4x12xbf16> to vector<4x12xbf16>
    %cst = arith.constant dense<0.000000e+00> : vector<256x12xf32>
    %11 = tpu.matmul %8, %10, %cst {dimension_numbers = #tpu.dot_dimension_numbers<[1], [0], [0], [1], [0, 0, 1, 1], [], []>} : vector<256x4xbf16>, vector<4x12xbf16>, vector<256x12xf32> -> vector<256x12xf32>
    %12 = vector.extract_strided_slice %4 {offsets = [1, 0, 0], sizes = [8, 32, 4], strides = [1, 1, 1]} : vector<10x32x4xbf16> to vector<8x32x4xbf16>
    %13 = vector.shape_cast %12 : vector<8x32x4xbf16> to vector<256x4xbf16>
    %14 = vector.extract_strided_slice %6 {offsets = [1, 0, 0], sizes = [1, 4, 12], strides = [1, 1, 1]} : vector<3x4x12xbf16> to vector<1x4x12xbf16>
    %15 = vector.shape_cast %14 : vector<1x4x12xbf16> to vector<4x12xbf16>
    %cst_11 = arith.constant dense<0.000000e+00> : vector<256x12xf32>
    %16 = tpu.matmul %13, %15, %cst_11 {dimension_numbers = #tpu.dot_dimension_numbers<[1], [0], [0], [1], [0, 0, 1, 1], [], []>} : vector<256x4xbf16>, vector<4x12xbf16>, vector<256x12xf32> -> vector<256x12xf32>
    %17 = arith.addf %11, %16 : vector<256x12xf32>
    %18 = vector.extract_strided_slice %4 {offsets = [2, 0, 0], sizes = [8, 32, 4], strides = [1, 1, 1]} : vector<10x32x4xbf16> to vector<8x32x4xbf16>
    %19 = vector.shape_cast %18 : vector<8x32x4xbf16> to vector<256x4xbf16>
    %20 = vector.extract_strided_slice %6 {offsets = [2, 0, 0], sizes = [1, 4, 12], strides = [1, 1, 1]} : vector<3x4x12xbf16> to vector<1x4x12xbf16>
    %21 = vector.shape_cast %20 : vector<1x4x12xbf16> to vector<4x12xbf16>
    %cst_12 = arith.constant dense<0.000000e+00> : vector<256x12xf32>
    %22 = tpu.matmul %19, %21, %cst_12 {dimension_numbers = #tpu.dot_dimension_numbers<[1], [0], [0], [1], [0, 0, 1, 1], [], []>} : vector<256x4xbf16>, vector<4x12xbf16>, vector<256x12xf32> -> vector<256x12xf32>
    %23 = arith.addf %17, %22 : vector<256x12xf32>
    %24 = vector.shape_cast %23 : vector<256x12xf32> to vector<8x32x12xf32>
    %25 = vector.extract_strided_slice %24 {offsets = [0, 0, 0], sizes = [8, 16, 4], strides = [1, 1, 1]} : vector<8x32x12xf32> to vector<8x16x4xf32>
    %26 = vector.extract_strided_slice %24 {offsets = [0, 1, 4], sizes = [8, 16, 4], strides = [1, 1, 1]} : vector<8x32x12xf32> to vector<8x16x4xf32>
    %27 = arith.addf %25, %26 : vector<8x16x4xf32>
    %28 = vector.extract_strided_slice %24 {offsets = [0, 2, 8], sizes = [8, 16, 4], strides = [1, 1, 1]} : vector<8x32x12xf32> to vector<8x16x4xf32>
    %29 = arith.addf %27, %28 : vector<8x16x4xf32>
    %c0_13 = arith.constant 0 : index
    %c0_14 = arith.constant 0 : index
    %c0_15 = arith.constant 0 : index
    %30 = vector.load %arg5[%c0_13, %c0_14, %c0_15] : memref<2x1x4xf32, #tpu.memory_space<vmem>>, vector<1x1x4xf32>
    %31 = vector.shape_cast %30 : vector<1x1x4xf32> to vector<1x4xf32>
    %32 = vector.shape_cast %31 : vector<1x4xf32> to vector<1x1x4xf32>
    %33 = vector.broadcast %32 : vector<1x1x4xf32> to vector<8x16x4xf32>
    %34 = arith.addf %29, %33 : vector<8x16x4xf32>
    %cst_16 = arith.constant 0.000000e+00 : f32
    %35 = vector.broadcast %cst_16 : f32 to vector<8x16x4xf32>
    %36 = arith.maximumf %34, %35 : vector<8x16x4xf32>
    %37 = arith.truncf %36 : vector<8x16x4xf32> to vector<8x16x4xbf16>
    %c0_17 = arith.constant 0 : index
    %c0_18 = arith.constant 0 : index
    %c0_19 = arith.constant 0 : index
    %c0_20 = arith.constant 0 : index
    %38 = vector.load %arg6[%c0_17, %c0_18, %c0_19, %c0_20] : memref<1x8x16x8xbf16, #tpu.memory_space<vmem>>, vector<1x8x16x4xbf16>
    %39 = vector.shape_cast %38 : vector<1x8x16x4xbf16> to vector<8x16x4xbf16>
    %40 = vector.shape_cast %37 : vector<8x16x4xbf16> to vector<1x8x16x4xbf16>
    tpu.vector_store %arg6[%c0_17, %c0_18, %c0_19, %c0_20], %40 {strides = array<i32>} : memref<1x8x16x8xbf16, #tpu.memory_space<vmem>>, vector<1x8x16x4xbf16>,
    %c1 = arith.constant 1 : index
    %c0_21 = arith.constant 0 : index
    %c0_22 = arith.constant 0 : index
    %c0_23 = arith.constant 0 : index
    %41 = vector.load %arg4[%c1, %c0_21, %c0_22, %c0_23] : memref<2x3x4x12xbf16, #tpu.memory_space<vmem>>, vector<1x3x4x12xbf16>
    %42 = vector.shape_cast %41 : vector<1x3x4x12xbf16> to vector<3x4x12xbf16>
    %43 = vector.extract_strided_slice %4 {offsets = [0, 0, 0], sizes = [8, 32, 4], strides = [1, 1, 1]} : vector<10x32x4xbf16> to vector<8x32x4xbf16>
    %44 = vector.shape_cast %43 : vector<8x32x4xbf16> to vector<256x4xbf16>
    %45 = vector.extract_strided_slice %42 {offsets = [0, 0, 0], sizes = [1, 4, 12], strides = [1, 1, 1]} : vector<3x4x12xbf16> to vector<1x4x12xbf16>
    %46 = vector.shape_cast %45 : vector<1x4x12xbf16> to vector<4x12xbf16>
    %cst_24 = arith.constant dense<0.000000e+00> : vector<256x12xf32>
    %47 = tpu.matmul %44, %46, %cst_24 {dimension_numbers = #tpu.dot_dimension_numbers<[1], [0], [0], [1], [0, 0, 1, 1], [], []>} : vector<256x4xbf16>, vector<4x12xbf16>, vector<256x12xf32> -> vector<256x12xf32>
    %48 = vector.extract_strided_slice %4 {offsets = [1, 0, 0], sizes = [8, 32, 4], strides = [1, 1, 1]} : vector<10x32x4xbf16> to vector<8x32x4xbf16>
    %49 = vector.shape_cast %48 : vector<8x32x4xbf16> to vector<256x4xbf16>
    %50 = vector.extract_strided_slice %42 {offsets = [1, 0, 0], sizes = [1, 4, 12], strides = [1, 1, 1]} : vector<3x4x12xbf16> to vector<1x4x12xbf16>
    %51 = vector.shape_cast %50 : vector<1x4x12xbf16> to vector<4x12xbf16>
    %cst_25 = arith.constant dense<0.000000e+00> : vector<256x12xf32>
    %52 = tpu.matmul %49, %51, %cst_25 {dimension_numbers = #tpu.dot_dimension_numbers<[1], [0], [0], [1], [0, 0, 1, 1], [], []>} : vector<256x4xbf16>, vector<4x12xbf16>, vector<256x12xf32> -> vector<256x12xf32>
    %53 = arith.addf %47, %52 : vector<256x12xf32>
    %54 = vector.extract_strided_slice %4 {offsets = [2, 0, 0], sizes = [8, 32, 4], strides = [1, 1, 1]} : vector<10x32x4xbf16> to vector<8x32x4xbf16>
    %55 = vector.shape_cast %54 : vector<8x32x4xbf16> to vector<256x4xbf16>
    %56 = vector.extract_strided_slice %42 {offsets = [2, 0, 0], sizes = [1, 4, 12], strides = [1, 1, 1]} : vector<3x4x12xbf16> to vector<1x4x12xbf16>
    %57 = vector.shape_cast %56 : vector<1x4x12xbf16> to vector<4x12xbf16>
    %cst_26 = arith.constant dense<0.000000e+00> : vector<256x12xf32>
    %58 = tpu.matmul %55, %57, %cst_26 {dimension_numbers = #tpu.dot_dimension_numbers<[1], [0], [0], [1], [0, 0, 1, 1], [], []>} : vector<256x4xbf16>, vector<4x12xbf16>, vector<256x12xf32> -> vector<256x12xf32>
    %59 = arith.addf %53, %58 : vector<256x12xf32>
    %60 = vector.shape_cast %59 : vector<256x12xf32> to vector<8x32x12xf32>
    %61 = vector.extract_strided_slice %60 {offsets = [0, 0, 0], sizes = [8, 16, 4], strides = [1, 1, 1]} : vector<8x32x12xf32> to vector<8x16x4xf32>
    %62 = vector.extract_strided_slice %60 {offsets = [0, 1, 4], sizes = [8, 16, 4], strides = [1, 1, 1]} : vector<8x32x12xf32> to vector<8x16x4xf32>
    %63 = arith.addf %61, %62 : vector<8x16x4xf32>
    %64 = vector.extract_strided_slice %60 {offsets = [0, 2, 8], sizes = [8, 16, 4], strides = [1, 1, 1]} : vector<8x32x12xf32> to vector<8x16x4xf32>
    %65 = arith.addf %63, %64 : vector<8x16x4xf32>
    %c1_27 = arith.constant 1 : index
    %c0_28 = arith.constant 0 : index
    %c0_29 = arith.constant 0 : index
    %66 = vector.load %arg5[%c1_27, %c0_28, %c0_29] : memref<2x1x4xf32, #tpu.memory_space<vmem>>, vector<1x1x4xf32>
    %67 = vector.shape_cast %66 : vector<1x1x4xf32> to vector<1x4xf32>
    %68 = vector.shape_cast %67 : vector<1x4xf32> to vector<1x1x4xf32>
    %69 = vector.broadcast %68 : vector<1x1x4xf32> to vector<8x16x4xf32>
    %70 = arith.addf %65, %69 : vector<8x16x4xf32>
    %cst_30 = arith.constant 0.000000e+00 : f32
    %71 = vector.broadcast %cst_30 : f32 to vector<8x16x4xf32>
    %72 = arith.maximumf %70, %71 : vector<8x16x4xf32>
    %73 = arith.truncf %72 : vector<8x16x4xf32> to vector<8x16x4xbf16>
    %c0_31 = arith.constant 0 : index
    %c0_32 = arith.constant 0 : index
    %c0_33 = arith.constant 0 : index
    %c4 = arith.constant 4 : index
    %74 = vector.load %arg6[%c0_31, %c0_32, %c0_33, %c4] : memref<1x8x16x8xbf16, #tpu.memory_space<vmem>>, vector<1x8x16x4xbf16>
    %75 = vector.shape_cast %74 : vector<1x8x16x4xbf16> to vector<8x16x4xbf16>
    %76 = vector.shape_cast %73 : vector<8x16x4xbf16> to vector<1x8x16x4xbf16>
    tpu.vector_store %arg6[%c0_31, %c0_32, %c0_33, %c4], %76 {strides = array<i32>} : memref<1x8x16x8xbf16, #tpu.memory_space<vmem>>, vector<1x8x16x4xbf16>,
    return
  }
  func.func @transform_0(%arg0: i32, %arg1: i32) -> (i32, i32, i32, i32) {
    %c0_i32 = arith.constant 0 : i32
    %c0_i32_0 = arith.constant 0 : i32
    %c0_i32_1 = arith.constant 0 : i32
    return %arg0, %arg1, %c0_i32, %c0_i32_0 : i32, i32, i32, i32
  }
  func.func @transform_1(%arg0: i32, %arg1: i32) -> (i32, i32, i32, i32) {
    %c4_i32 = arith.constant 4 : i32
    %0 = arith.muli %arg1, %c4_i32 : i32
    %c4_i32_0 = arith.constant 4 : i32
    %1 = arith.addi %0, %c4_i32_0 : i32
    %c0_i32 = arith.constant 0 : i32
    %c0_i32_1 = arith.constant 0 : i32
    %c0_i32_2 = arith.constant 0 : i32
    return %arg0, %1, %c0_i32, %c0_i32_1 : i32, i32, i32, i32
  }
  func.func @transform_2(%arg0: i32, %arg1: i32) -> (i32, i32, i32, i32) {
    %c0_i32 = arith.constant 0 : i32
    %c0_i32_0 = arith.constant 0 : i32
    %c0_i32_1 = arith.constant 0 : i32
    %c0_i32_2 = arith.constant 0 : i32
    %c0_i32_3 = arith.constant 0 : i32
    return %c0_i32, %c0_i32_0, %c0_i32_1, %c0_i32_2 : i32, i32, i32, i32
  }
  func.func @transform_3(%arg0: i32, %arg1: i32) -> (i32, i32, i32) {
    %c0_i32 = arith.constant 0 : i32
    %c0_i32_0 = arith.constant 0 : i32
    %c0_i32_1 = arith.constant 0 : i32
    %c0_i32_2 = arith.constant 0 : i32
    return %c0_i32, %c0_i32_0, %c0_i32_1 : i32, i32, i32
  }
  func.func @transform_4(%arg0: i32, %arg1: i32) -> (i32, i32, i32, i32) {
    %c0_i32 = arith.constant 0 : i32
    %c0_i32_0 = arith.constant 0 : i32
    %c0_i32_1 = arith.constant 0 : i32
    return %arg0, %arg1, %c0_i32, %c0_i32_0 : i32, i32, i32, i32
  }
}

</mosaic_0001>

<bundles_post_ra>
// kernel: tpu_custom_call.1
= control target key start
LH: loop header
LB: loop body
LE: loop exit
PB: predicated region body
PF: predicated region fallthrough
CT: control target
= control target key end

     0   :  { %s2210_s15 = smov 0   ;;  %s2212_s16 = smov 0   ;;  %s3058_s0 = inlined_call_operand.vmem [shape: bf16[2,18,32,4], index: 0, kind: input, shape index: {}]   ;;  %s3059_s1 = inlined_call_operand.vmem [shape: bf16[2,18,32,4], index: 1, kind: input, shape index: {}]   ;;  %s3060_s2 = inlined_call_operand.vmem [shape: bf16[2,3,4,12], index: 2, kind: input, shape index: {}]   ;;  %s3061_s3 = inlined_call_operand.vmem [shape: f32[2,1,4], index: 3, kind: input, shape index: {}]   ;;  %s3062_s4 = inlined_call_operand.vmem [shape: bf16[2,16,16,8], index: 4, kind: output, shape index: {}]  }
   0x1   :  { %s2214_s17 = smov 0   ;;  %s2216_s18 = smov 0  }
   0x2   :  { %s2218_s19 = smov 0  }
   0x3 LB: > { %s23_s20 = sadd.s32 1, %s2172_s17  ;;  %s26_s21 = sadd.s32 1, %s2176_s18  ;;  %s2180_s19 = sphi %s2218_s19, %s14_s19   ;;  %s2176_s18 = sphi %s2216_s18, %s3066_s18   ;;  %s2172_s17 = sphi %s2214_s17, %s3065_s17   ;;  %s2168_s16 = sphi %s2212_s16, %s3064_s16   ;;  %s2164_s15 = sphi %s2210_s15, %s3063_s15  }
   0x4   : > { %p24_p0 = scmp.ge.s32.totalorder %s23_s20, 2  ;;  %p1877_p1 = scmp.ge.s32.totalorder %s2180_s19, 1 }
   0x5   : > { %p220_p2 = scmp.lt.s32.totalorder %s2180_s19, 5 }
   0x6   : > { %s3068_s20 = smov (%p24_p0, %s23_s20), 0  ;;  %s3070_s21 = smov (!%p24_p0, %s26_s21), %s2176_s18 }
   0x7   : > { %p221_p3 = pnand %p1877_p1, %p220_p2  ;;  %p28_p4 = scmp.ge.s32.totalorder %s3070_s21, 2 }
   0x8   : > { %s2246_s26 = sshll.u32 (!%p221_p3), %s2164_s15, 3  ;;  %p279_p5 = scmp.lt.s32.totalorder (!%p221_p3), %s2168_s16, 1 }
   0x9   : > { %s3072_s21 = smov (%p28_p4, %s3070_s21), 0  ;;  %224 = sbr.rel (%p221_p3) target bundleno = 776 (0x308), region = 36 }
   0xa   : > { %p281_p6 = scmp.lt.s32.totalorder (!%p221_p3), %s2246_s26, 17  ;;  %s2072_s23 = sadd.s32 (!%p221_p3), 8, %s2246_s26 }
   0xb   : > { %p299_p7 = scmp.lt.s32.totalorder (!%p221_p3), %s2072_s23, 17  ;;  %s2182_s5 = smov (!%p221_p3), 120  }
   0xc   : > { %s2183_s6 = smov (!%p221_p3), 124   ;;  %p312_p8 = scmp.lt.s32.totalorder (!%p221_p3), %s2246_s26, 15 }
   0xe   : > { %v362_v0 = vld [vmem:[%s3060_s2 + $0x2] sm:$0x3]  ;;  %vm493_vm0 = vcmask 1041408   ;;  %v361_v1 = vld [vmem:[%s3060_s2] sm:$0x3]  ;;  %s3074_s16 = smov (!%p279_p5, %s2168_s16), 1 }
   0xf   : > { %v495_v2 = vsel %vm493_vm0, %v362_v0, 0  ;;  %v595_v3 = vsel %vm493_vm0, %v361_v1, 0  ;;  %v363_v4 = vld [vmem:[%s3060_s2 + $0x4] sm:$0x3]  ;;  %v2018_v5 = vld [vmem:[%s3060_s2 + $0x8] sm:$0x3] }
  0x10   : > { %2094 = vmatpush.bf16.msra.mxu2 %v495_v2  ;;  %2095 = vmatpush.bf16.msra.mxu3 %v595_v3  ;;  %v2017_v6 = vld [vmem:[%s3060_s2 + $0x6] sm:$0x3]  ;;  %v695_v7 = vsel %vm493_vm0, %v363_v4, 0  ;;  %v1110_v8 = vsel %vm493_vm0, %v2018_v5, 0  ;;  %v2019_v10 = vld [vmem:[%s3060_s2 + $0xa] sm:$0x3] }
  0x11   : > { %504 = vmatpush.bf16.msra.mxu0 %v495_v2  ;;  %604 = vmatpush.bf16.msra.mxu1 %v595_v3  ;;  %v1194_v9 = vsel %vm493_vm0, %v2017_v6, 0  ;;  %s282_s9 = scalar_select %p281_p6, %s2246_s26, 17  ;;  %v1278_v11 = vsel %vm493_vm0, %v2019_v10, 0  ;;  %vm444_vm1 = vcmask 31744   ;;  %vm931_vm2 = vcmask 1045504  }
  0x12   : > { %s2096_s10 = smul.u32 72, %s3074_s16  ;;  %s3076_s23 = smov (!%p299_p7, %s2072_s23), 17  ;;  %vm826_vm3 = vcmask 1046528   ;;  %vm1088_vm4 = vcmask 27648   ;;  %vm1734_vm5 = vcmask 60448  }
  0x13   : > { %s1879_s11 = sshll.u32 %s282_s9, 2  ;;  %s1883_s24 = sshll.u32 %s3076_s23, 2 }
  0x14   : > { %704 = vmatpush.bf16.msrb.mxu2 %v695_v7  ;;  %1119 = vmatpush.bf16.msrb.mxu3 %v1110_v8  ;;  %s285_s12 = sadd.s32 %s2096_s10, %s1879_s11  ;;  %s303_s25 = sadd.s32 %s2096_s10, %s1883_s24 }
  0x15   : > { %1203 = vmatpush.bf16.msrb.mxu0 %v1194_v9  ;;  %1287 = vmatpush.bf16.msrb.mxu1 %v1278_v11  ;;  %s1880_s13 = sshll.u32 %s285_s12, 2  ;;  %s1884_s27 = sshll.u32 %s303_s25, 2 }
  0x16   : > { %s2276_s22 = scalar_lea.vmem %s3058_s0, %s1880_s13  ;;  %s2377_s30 = scalar_lea.vmem %s3059_s1, %s1884_s27 }
  0x17   : > { %v2279_v12 = vld [vmem:[%s2276_s22 + $0x50] sm:$0xff]  ;;  %v2282_v13 = vld [vmem:[%s2276_s22 + $0x40] sm:$0xff]  ;;  %v2296_v16 = vld [vmem:[%s2276_s22 + $0x58] sm:$0xff]  ;;  %s3078_s26 = smov (!%p312_p8, %s2246_s26), 15  ;;  %s1887_s8 = sshll.u32 %s3074_s16, 5 }
  0x18   : > { %v2285_v14 = vld [vmem:[%s2276_s22 + $0x10] sm:$0xff]  ;;  %v2073_v15 = vld [vmem:[%s2276_s22] sm:$0xff]  ;;  %1961 = vmatmul.msk.bf16.vlgmr.msra.gmra.mxu2 %vm444_vm1, %v2279_v12  ;;  %1985 = vmatmul.msk.bf16.vlgmr.msra.gmra.mxu3 %vm444_vm1, %v2282_v13  ;;  %v2299_v17 = vld [vmem:[%s2276_s22 + $0x48] sm:$0xff]  ;;  %s1886_s7 = sshll.u32 %s3078_s26, 1 }
  0x19   : > { %1953 = vmatmul.msk.bf16.vlgmr.msra.gmra.mxu0 %vm444_vm1, %v2285_v14  ;;  %1977 = vmatmul.msk.bf16.vlgmr.msra.gmra.mxu1 %vm444_vm1, %v2073_v15  ;;  %v2302_v18 = vld [vmem:[%s2276_s22 + $0x18] sm:$0xff]  ;;  %v2305_v19 = vld [vmem:[%s2276_s22 + $0x8] sm:$0xff]  ;;  %v2316_v20 = vld [vmem:[%s2276_s22 + $0x60] sm:$0xff]  ;;  %s316_s11 = sadd.s32 %s1887_s8, %s1886_s7 }
  0x1a   : > { %v2319_v21 = vld [vmem:[%s2276_s22 + $0x20] sm:$0xff]  ;;  %v2330_v22 = vld [vmem:[%s2276_s22 + $0x68] sm:$0xff]  ;;  %v2344_v24 = vld [vmem:[%s2276_s22 + $0x70] sm:$0xff]  ;;  %s1888_s16 = sshll.u32 %s316_s11, 2 }
  0x1b   : > { %v2333_v23 = vld [vmem:[%s2276_s22 + $0x28] sm:$0xff]  ;;  %v2347_v25 = vld [vmem:[%s2276_s22 + $0x30] sm:$0xff]  ;;  %v2359_v26 = vld [vmem:[%s2276_s22 + $0x78] sm:$0xff]  ;;  %s2736_s13 = scalar_lea.vmem %s3062_s4, %s1888_s16 }
  0x1c   : > { %v2362_v27 = vld [vmem:[%s2276_s22 + $0x38] sm:$0xff]  ;;  %v2380_v28 = vld [vmem:[%s2377_s30] sm:$0xff]  ;;  %v2391_v29 = vld [vmem:[%s2377_s30 + $0x8] sm:$0xff]  ;;  %s2184_s22 = smov 4  }
  0x28   : > { %1962 = vmatmul.msk.bf16.gmra.mxu2 %vm444_vm1, %v2296_v16  ;;  %1986 = vmatmul.msk.bf16.gmra.mxu3 %vm444_vm1, %v2299_v17 }
  0x29   : > { %1954 = vmatmul.msk.bf16.gmra.mxu0 %vm444_vm1, %v2302_v18  ;;  %1978 = vmatmul.msk.bf16.gmra.mxu1 %vm444_vm1, %v2305_v19 }
  0x38   : > { %1963 = vmatmul.msk.bf16.gmra.mxu2 %vm444_vm1, %v2316_v20  ;;  %1987 = vmatmul.msk.bf16.gmra.mxu3 %vm444_vm1, %v2279_v12 }
  0x39   : > { %1955 = vmatmul.msk.bf16.gmra.mxu0 %vm444_vm1, %v2319_v21  ;;  %1979 = vmatmul.msk.bf16.gmra.mxu1 %vm444_vm1, %v2285_v14 }
  0x48   : > { %1964 = vmatmul.msk.bf16.gmra.mxu2 %vm444_vm1, %v2330_v22  ;;  %1988 = vmatmul.msk.bf16.gmra.mxu3 %vm444_vm1, %v2296_v16 }
  0x49   : > { %1956 = vmatmul.msk.bf16.gmra.mxu0 %vm444_vm1, %v2333_v23  ;;  %1980 = vmatmul.msk.bf16.gmra.mxu1 %vm444_vm1, %v2302_v18 }
  0x58   : > { %1965 = vmatmul.msk.bf16.gmra.mxu2 %vm444_vm1, %v2344_v24  ;;  %1989 = vmatmul.msk.bf16.gmra.mxu3 %vm444_vm1, %v2316_v20 }
  0x59   : > { %1957 = vmatmul.msk.bf16.gmra.mxu0 %vm444_vm1, %v2347_v25  ;;  %1981 = vmatmul.msk.bf16.gmra.mxu1 %vm444_vm1, %v2319_v21 }
  0x68   : > { %1966 = vmatmul.msk.bf16.gmra.mxu2 %vm444_vm1, %v2359_v26  ;;  %1990 = vmatmul.msk.bf16.gmra.mxu3 %vm444_vm1, %v2330_v22 }
  0x69   : > { %1958 = vmatmul.msk.bf16.gmra.mxu0 %vm444_vm1, %v2362_v27  ;;  %1982 = vmatmul.msk.bf16.gmra.mxu1 %vm444_vm1, %v2333_v23 }
  0x78   : > { %1967 = vmatmul.msk.bf16.gmra.mxu2 %vm444_vm1, %v2380_v28  ;;  %1991 = vmatmul.msk.bf16.gmra.mxu3 %vm444_vm1, %v2344_v24 }
  0x79   : > { %1959 = vmatmul.msk.bf16.gmra.mxu0 %vm444_vm1, %v2282_v13  ;;  %1983 = vmatmul.msk.bf16.gmra.mxu1 %vm444_vm1, %v2347_v25 }
  0x88   : > { %1968 = vmatmul.msk.bf16.gmra.mxu2 %vm444_vm1, %v2391_v29  ;;  %1992 = vmatmul.msk.bf16.gmra.mxu3 %vm444_vm1, %v2359_v26 }
  0x89   : > { %1960 = vmatmul.msk.bf16.gmra.mxu0 %vm444_vm1, %v2299_v17  ;;  %1984 = vmatmul.msk.bf16.gmra.mxu1 %vm444_vm1, %v2362_v27 }
  0x96   : > { %v506_v30 = vpop.f32.mrf.mxu0  ;;  %v606_v31 = vpop.f32.mrf.mxu1 }
  0x97   : > { %v2401_v32 = vadd.f32 %v606_v31, %v506_v30 }
  0x98   : > { %2001 = vmatmul.msk.bf16.vlgmr.msrb.gmra.mxu2 %vm444_vm1, %v2319_v21  ;;  %2020 = vmatmul.msk.bf16.vlgmr.msrb.gmra.mxu3 %vm444_vm1, %v2285_v14 }
  0x99   : > { %2036 = vmatmul.msk.bf16.vlgmr.msrb.gmra.mxu0 %vm444_vm1, %v2073_v15  ;;  %2052 = vmatmul.msk.bf16.vlgmr.msrb.gmra.mxu1 %vm444_vm1, %v2319_v21 }
  0x9b   : > { %v542_v33 = vpop.f32.mrf.mxu2  ;;  %v642_v34 = vpop.f32.mrf.mxu3 }
  0x9c   : > { %v2410_v35 = vadd.f32 %v642_v34, %v542_v33 }
  0x9e   : > { %v508_v36 = vpop.f32.mrf.mxu0  ;;  %v608_v37 = vpop.f32.mrf.mxu1 }
  0x9f   : > { %v2412_v38 = vadd.f32 %v608_v37, %v508_v36 }
  0xa3   : > { %v544_v39 = vpop.f32.mrf.mxu2  ;;  %v644_v40 = vpop.f32.mrf.mxu3 }
  0xa4   : > { %v2414_v41 = vadd.f32 %v644_v40, %v544_v39 }
  0xa6   : > { %v511_v42 = vpop.f32.mrf.mxu0  ;;  %v611_v43 = vpop.f32.mrf.mxu1 }
  0xa7   : > { %v2416_v44 = vadd.f32 %v611_v43, %v511_v42 }
  0xa8   : > { %2002 = vmatmul.msk.bf16.gmra.mxu2 %vm444_vm1, %v2333_v23  ;;  %2021 = vmatmul.msk.bf16.gmra.mxu3 %vm444_vm1, %v2302_v18 }
  0xa9   : > { %2037 = vmatmul.msk.bf16.gmra.mxu0 %vm444_vm1, %v2305_v19  ;;  %2053 = vmatmul.msk.bf16.gmra.mxu1 %vm444_vm1, %v2333_v23 }
  0xab   : > { %v547_v45 = vpop.f32.mrf.mxu2  ;;  %v647_v46 = vpop.f32.mrf.mxu3 }
  0xac   : > { %v2426_v47 = vadd.f32 %v647_v46, %v547_v45 }
  0xae   : > { %v513_v48 = vpop.f32.mrf.mxu0  ;;  %v613_v49 = vpop.f32.mrf.mxu1 }
  0xb3   : > { %v549_v50 = vpop.f32.mrf.mxu2  ;;  %v649_v51 = vpop.f32.mrf.mxu3 }
  0xb6   : > { %v515_v52 = vpop.f32.mrf.mxu0  ;;  %v615_v53 = vpop.f32.mrf.mxu1 }
  0xb7   : > { %v2428_v54 = vadd.f32 %v615_v53, %v515_v52 }
  0xb8   : > { %2003 = vmatmul.msk.bf16.gmra.mxu2 %vm444_vm1, %v2347_v25  ;;  %2022 = vmatmul.msk.bf16.gmra.mxu3 %vm444_vm1, %v2319_v21 }
  0xb9   : > { %2038 = vmatmul.msk.bf16.gmra.mxu0 %vm444_vm1, %v2285_v14  ;;  %2054 = vmatmul.msk.bf16.gmra.mxu1 %vm444_vm1, %v2347_v25 }
  0xbb   : > { %v551_v55 = vpop.f32.mrf.mxu2  ;;  %v651_v56 = vpop.f32.mrf.mxu3 }
  0xbc   : > { %v2438_v57 = vadd.f32 %v651_v56, %v551_v55 }
  0xbe   : > { %v517_v58 = vpop.f32.mrf.mxu0  ;;  %v617_v59 = vpop.f32.mrf.mxu1 }
  0xbf   : > { %v2440_v60 = vadd.f32 %v617_v59, %v517_v58 }
  0xc3   : > { %v553_v61 = vpop.f32.mrf.mxu2  ;;  %v653_v62 = vpop.f32.mrf.mxu3 }
  0xc4   : > { %v2442_v63 = vadd.f32 %v653_v62, %v553_v61 }
  0xc6   : > { %v520_v0 = vpop.f32.mrf.mxu0  ;;  %v620_v1 = vpop.f32.mrf.mxu1 }
  0xc7   : > { %v2444_v2 = vadd.f32 %v620_v1, %v520_v0 }
  0xc8   : > { %2004 = vmatmul.msk.bf16.gmra.mxu2 %vm444_vm1, %v2362_v27  ;;  %2023 = vmatmul.msk.bf16.gmra.mxu3 %vm444_vm1, %v2333_v23 }
  0xc9   : > { %2039 = vmatmul.msk.bf16.gmra.mxu0 %vm444_vm1, %v2302_v18  ;;  %2055 = vmatmul.msk.bf16.gmra.mxu1 %vm444_vm1, %v2362_v27 }
  0xcb   : > { %v556_v3 = vpop.f32.mrf.mxu2  ;;  %v656_v4 = vpop.f32.mrf.mxu3 }
  0xcc   : > { %v2454_v5 = vadd.f32 %v656_v4, %v556_v3 }
  0xce   : > { %v522_v6 = vpop.f32.mrf.mxu0  ;;  %v622_v7 = vpop.f32.mrf.mxu1 }
  0xd3   : > { %v558_v8 = vpop.f32.mrf.mxu2  ;;  %v658_v9 = vpop.f32.mrf.mxu3 }
  0xd6   : > { %v524_v10 = vpop.f32.mrf.mxu0  ;;  %v624_v11 = vpop.f32.mrf.mxu1 }
  0xd7   : > { %v2456_v14 = vadd.f32 %v624_v11, %v524_v10 }
  0xd8   : > { %2005 = vmatmul.msk.bf16.gmra.mxu2 %vm444_vm1, %v2282_v13  ;;  %2024 = vmatmul.msk.bf16.gmra.mxu3 %vm444_vm1, %v2347_v25 }
  0xd9   : > { %2040 = vmatmul.msk.bf16.gmra.mxu0 %vm444_vm1, %v2319_v21  ;;  %2056 = vmatmul.msk.bf16.gmra.mxu1 %vm444_vm1, %v2282_v13 }
  0xdb   : > { %v560_v15 = vpop.f32.mrf.mxu2  ;;  %v660_v18 = vpop.f32.mrf.mxu3 }
  0xdc   : > { %v2466_v19 = vadd.f32 %v660_v18, %v560_v15 }
  0xde   : > { %v526_v30 = vpop.f32.mrf.mxu0  ;;  %v626_v31 = vpop.f32.mrf.mxu1 }
  0xdf   : > { %v2468_v33 = vadd.f32 %v626_v31, %v526_v30 }
  0xe3   : > { %v562_v34 = vpop.f32.mrf.mxu2  ;;  %v662_v36 = vpop.f32.mrf.mxu3 }
  0xe4   : > { %v2470_v37 = vadd.f32 %v662_v36, %v562_v34 }
  0xe6   : > { %v529_v39 = vpop.f32.mrf.mxu0  ;;  %v629_v40 = vpop.f32.mrf.mxu1 }
  0xe7   : > { %v2472_v42 = vadd.f32 %v629_v40, %v529_v39 }
  0xe8   : > { %2006 = vmatmul.msk.bf16.gmra.mxu2 %vm444_vm1, %v2299_v17  ;;  %2025 = vmatmul.msk.bf16.gmra.mxu3 %vm444_vm1, %v2362_v27 }
  0xe9   : > { %2041 = vmatmul.msk.bf16.gmra.mxu0 %vm444_vm1, %v2333_v23  ;;  %2057 = vmatmul.msk.bf16.gmra.mxu1 %vm444_vm1, %v2299_v17 }
  0xeb   : > { %v565_v21 = vpop.f32.mrf.mxu2  ;;  %v665_v43 = vpop.f32.mrf.mxu3 }
  0xec   : > { %v2482_v45 = vadd.f32 %v665_v43, %v565_v21 }
  0xee   : > { %v531_v46 = vpop.f32.mrf.mxu0  ;;  %v631_v48 = vpop.f32.mrf.mxu1 }
  0xf3   : > { %v567_v49 = vpop.f32.mrf.mxu2  ;;  %v667_v50 = vpop.f32.mrf.mxu3 }
  0xf6   : > { %v533_v51 = vpop.f32.mrf.mxu0  ;;  %v633_v52 = vpop.f32.mrf.mxu1 }
  0xf7   : > { %v2484_v53 = vadd.f32 %v633_v52, %v533_v51 }
  0xf8   : > { %2007 = vmatmul.msk.bf16.gmra.mxu2 %vm444_vm1, %v2279_v12  ;;  %2026 = vmatmul.msk.bf16.gmra.mxu3 %vm444_vm1, %v2282_v13 }
  0xf9   : > { %2042 = vmatmul.msk.bf16.gmra.mxu0 %vm444_vm1, %v2347_v25  ;;  %2058 = vmatmul.msk.bf16.gmra.mxu1 %vm444_vm1, %v2279_v12 }
  0xfb   : > { %v569_v23 = vpop.f32.mrf.mxu2  ;;  %v669_v55 = vpop.f32.mrf.mxu3 }
  0xfc   : > { %v2494_v56 = vadd.f32 %v669_v55, %v569_v23 }
  0xfe   : > { %v535_v58 = vpop.f32.mrf.mxu0  ;;  %v635_v59 = vpop.f32.mrf.mxu1 }
  0xff   : > { %v2496_v61 = vadd.f32 %v635_v59, %v535_v58 }
 0x103   : > { %v571_v62 = vpop.f32.mrf.mxu2  ;;  %v671_v0 = vpop.f32.mrf.mxu3 }
 0x104   : > { %v2498_v1 = vadd.f32 %v671_v0, %v571_v62 }
 0x106   : > { %v538_v3 = vpop.f32.mrf.mxu0  ;;  %v638_v4 = vpop.f32.mrf.mxu1 }
 0x107   : > { %v2500_v6 = vadd.f32 %v638_v4, %v538_v3 }
 0x108   : > { %2008 = vmatmul.msk.bf16.gmra.mxu2 %vm444_vm1, %v2296_v16  ;;  %2027 = vmatmul.msk.bf16.gmra.mxu3 %vm444_vm1, %v2299_v17 }
 0x109   : > { %2043 = vmatmul.msk.bf16.gmra.mxu0 %vm444_vm1, %v2362_v27  ;;  %2059 = vmatmul.msk.bf16.gmra.mxu1 %vm444_vm1, %v2296_v16 }
 0x10b   : > { %v574_v25 = vpop.f32.mrf.mxu2  ;;  %v674_v7 = vpop.f32.mrf.mxu3 }
 0x10c   : > { %v2510_v8 = vadd.f32 %v674_v7, %v574_v25 }
 0x10e   : > { %v540_v9 = vpop.f32.mrf.mxu0  ;;  %v640_v10 = vpop.f32.mrf.mxu1 }
 0x113   : > { %v576_v11 = vpop.f32.mrf.mxu2  ;;  %v676_v15 = vpop.f32.mrf.mxu3 }
 0x116   : > { %v1205_v18 = vpop.f32.mrf.mxu0  ;;  %v1289_v30 = vpop.f32.mrf.mxu1 }
 0x118   : > { %2009 = vmatmul.msk.bf16.gmra.mxu2 %vm444_vm1, %v2316_v20  ;;  %2028 = vmatmul.msk.bf16.gmra.mxu3 %vm444_vm1, %v2279_v12 }
 0x119   : > { %2044 = vmatmul.msk.bf16.gmra.mxu0 %vm444_vm1, %v2282_v13  ;;  %2060 = vmatmul.msk.bf16.gmra.mxu1 %vm444_vm1, %v2316_v20 }
 0x11b   : > { %v706_v27 = vpop.f32.mrf.mxu2  ;;  %v1121_v31 = vpop.f32.mrf.mxu3 }
 0x11c   : > { %v1206_v39 = vadd.f32 %v1205_v18, %v1121_v31  ;;  %v2521_v40 = vadd.f32 %v706_v27, %v2401_v32 }
 0x11e   : > { %v1207_v34 = vpop.f32.mrf.mxu0  ;;  %v1291_v36 = vpop.f32.mrf.mxu1  ;;  %v2523_v46 = vadd.f32 %v1289_v30, %v1206_v39  ;;  %v932_v13 = vrot.slane %v2521_v40, 2  ;;  %v827_v32 = vrot.slane %v2521_v40, 1 }
 0x120   : > { %v1409_v59 = vrot.slane %v2523_v46, 1  ;;  %v1513_v10 = vrot.slane %v2523_v46, 2 }
 0x123   : > { %v708_v21 = vpop.f32.mrf.mxu2  ;;  %v1123_v43 = vpop.f32.mrf.mxu3 }
 0x124   : > { %v2526_v48 = vadd.f32 %v708_v21, %v2412_v38  ;;  %v1208_v49 = vadd.f32 %v1207_v34, %v1123_v43 }
 0x126   : > { %v2529_v50 = vadd.f32 %v1291_v36, %v1208_v49  ;;  %v1210_v51 = vpop.f32.mrf.mxu0  ;;  %v933_v52 = vrot.slane %v2526_v48, 2  ;;  %v828_v23 = vrot.slane %v2526_v48, 1  ;;  %v1294_v55 = vpop.f32.mrf.mxu1 }
 0x128   : > { %2010 = vmatmul.msk.bf16.gmra.mxu2 %vm444_vm1, %v2330_v22  ;;  %2029 = vmatmul.msk.bf16.gmra.mxu3 %vm444_vm1, %v2296_v16  ;;  %v934_v38 = vsel %vm931_vm2, %v932_v13, %v933_v52  ;;  %v829_v58 = vsel %vm826_vm3, %v827_v32, %v828_v23  ;;  %v1410_v62 = vrot.slane %v2529_v50, 1  ;;  %v1514_v9 = vrot.slane %v2529_v50, 2 }
 0x129   : > { %972 = vrot.lane.b32.xlu1 %v934_v38, %s2182_s5  ;;  %867 = vrot.lane.b32.xlu0 %v829_v58, %s2183_s6 }
 0x12a   : > { %v1411_v0 = vsel %vm826_vm3, %v1409_v59, %v1410_v62  ;;  %2045 = vmatmul.msk.bf16.gmra.mxu0 %vm444_vm1, %v2299_v17  ;;  %2061 = vmatmul.msk.bf16.gmra.mxu1 %vm444_vm1, %v2330_v22  ;;  %v1515_v17 = vsel %vm931_vm2, %v1513_v10, %v1514_v9 }
 0x12b   : > { %v711_v3 = vpop.f32.mrf.mxu2  ;;  %v1126_v4 = vpop.f32.mrf.mxu3  ;;  %1449 = vrot.lane.b32.xlu2 %v1411_v0, %s2183_s6 }
 0x12c   : > { %v780_v25 = vadd.f32 %v711_v3, %v2416_v44  ;;  %v1211_v7 = vadd.f32 %v1210_v51, %v1126_v4 }
 0x12e   : > { %v935_v11 = vrot.slane %v780_v25, 2  ;;  %v1363_v15 = vadd.f32 %v1294_v55, %v1211_v7  ;;  %v1212_v18 = vpop.f32.mrf.mxu0  ;;  %v1296_v30 = vpop.f32.mrf.mxu1  ;;  %v830_v39 = vrot.slane %v780_v25, 1 }
 0x130   : > { %v1516_v27 = vrot.slane %v1363_v15, 2  ;;  %v936_v31 = vsel %vm931_vm2, %v933_v52, %v935_v11  ;;  %v831_v49 = vsel %vm826_vm3, %v828_v23, %v830_v39  ;;  %v1412_v52 = vrot.slane %v1363_v15, 1 }
 0x131   : > { %1553 = vrot.lane.b32.xlu0 %v1515_v17, %s2182_s5 }
 0x132   : > { %v1517_v34 = vsel %vm931_vm2, %v1514_v9, %v1516_v27  ;;  %v1413_v58 = vsel %vm826_vm3, %v1410_v62, %v1412_v52 }
 0x133   : > { %v713_v36 = vpop.f32.mrf.mxu2  ;;  %v1128_v44 = vpop.f32.mrf.mxu3  ;;  %974 = vrot.lane.b32.xlu2 %v936_v31, %s2182_s5  ;;  %1555 = vrot.lane.b32.xlu1 %v1517_v34, %s2182_s5 }
 0x136   : > { %v1214_v21 = vpop.f32.mrf.mxu0  ;;  %v1298_v43 = vpop.f32.mrf.mxu1 }
 0x138   : > { %2011 = vmatmul.msk.bf16.gmra.mxu2 %vm444_vm1, %v2344_v24  ;;  %2030 = vmatmul.msk.bf16.gmra.mxu3 %vm444_vm1, %v2316_v20 }
 0x139   : > { %869 = vrot.lane.b32.xlu0 %v831_v49, %s2183_s6 }
 0x13a   : > { %2046 = vmatmul.msk.bf16.gmra.mxu0 %vm444_vm1, %v2279_v12  ;;  %2062 = vmatmul.msk.bf16.gmra.mxu1 %vm444_vm1, %v2344_v24 }
 0x13b   : > { %v715_v13 = vpop.f32.mrf.mxu2  ;;  %v1130_v51 = vpop.f32.mrf.mxu3 }
 0x13c   : > { %v1215_v38 = vadd.f32 %v1214_v21, %v1130_v51  ;;  %v2571_v59 = vadd.f32 %v715_v13, %v2428_v54 }
 0x13e   : > { %v1216_v32 = vpop.f32.mrf.mxu0  ;;  %v1300_v55 = vpop.f32.mrf.mxu1  ;;  %v2574_v3 = vadd.f32 %v1298_v43, %v1215_v38  ;;  %v832_v25 = vrot.slane %v2571_v59, 1  ;;  %v937_v7 = vrot.slane %v2571_v59, 2 }
 0x140   : > { %v1518_v15 = vrot.slane %v2574_v3, 2  ;;  %v1414_v44 = vrot.slane %v2574_v3, 1 }
 0x141   : > { %1451 = vrot.lane.b32.xlu0 %v1413_v58, %s2183_s6 }
 0x143   : > { %v717_v23 = vpop.f32.mrf.mxu2  ;;  %v1132_v0 = vpop.f32.mrf.mxu3 }
 0x144   : > { %v2577_v12 = vadd.f32 %v717_v23, %v2440_v60  ;;  %v1217_v4 = vadd.f32 %v1216_v32, %v1132_v0 }
 0x146   : > { %v2581_v9 = vadd.f32 %v1300_v55, %v1217_v4  ;;  %v1219_v62 = vpop.f32.mrf.mxu0  ;;  %v833_v54 = vrot.slane %v2577_v12, 1  ;;  %v938_v10 = vrot.slane %v2577_v12, 2  ;;  %v1303_v11 = vpop.f32.mrf.mxu1 }
 0x148   : > { %2012 = vmatmul.msk.bf16.gmra.mxu2 %vm444_vm1, %v2359_v26  ;;  %2031 = vmatmul.msk.bf16.gmra.mxu3 %vm444_vm1, %v2330_v22  ;;  %v834_v60 = vsel %vm826_vm3, %v832_v25, %v833_v54  ;;  %v939_v18 = vsel %vm931_vm2, %v937_v7, %v938_v10  ;;  %v1519_v30 = vrot.slane %v2581_v9, 2  ;;  %v1415_v36 = vrot.slane %v2581_v9, 1 }
 0x149   : > { %871 = vrot.lane.b32.xlu1 %v834_v60, %s2183_s6  ;;  %976 = vrot.lane.b32.xlu0 %v939_v18, %s2182_s5 }
 0x14a   : > { %v1520_v27 = vsel %vm931_vm2, %v1518_v15, %v1519_v30  ;;  %2047 = vmatmul.msk.bf16.gmra.mxu0 %vm444_vm1, %v2296_v16  ;;  %2063 = vmatmul.msk.bf16.gmra.mxu1 %vm444_vm1, %v2359_v26  ;;  %v1416_v16 = vsel %vm826_vm3, %v1414_v44, %v1415_v36 }
 0x14b   : > { %v720_v17 = vpop.f32.mrf.mxu2  ;;  %v1135_v31 = vpop.f32.mrf.mxu3  ;;  %1557 = vrot.lane.b32.xlu2 %v1520_v27, %s2182_s5 }
 0x14c   : > { %v1220_v34 = vadd.f32 %v1219_v62, %v1135_v31  ;;  %v783_v49 = vadd.f32 %v720_v17, %v2444_v2 }
 0x14e   : > { %v1366_v39 = vadd.f32 %v1303_v11, %v1220_v34  ;;  %v1221_v21 = vpop.f32.mrf.mxu0  ;;  %v1305_v43 = vpop.f32.mrf.mxu1  ;;  %v835_v58 = vrot.slane %v783_v49, 1  ;;  %v940_v7 = vrot.slane %v783_v49, 2 }
 0x150   : > { %v1417_v13 = vrot.slane %v1366_v39, 1  ;;  %v1521_v51 = vrot.slane %v1366_v39, 2  ;;  %v836_v2 = vsel %vm826_vm3, %v833_v54, %v835_v58  ;;  %v941_v60 = vsel %vm931_vm2, %v938_v10, %v940_v7 }
 0x151   : > { %1453 = vrot.lane.b32.xlu1 %v1416_v16, %s2183_s6 }
 0x152   : > { %v1418_v52 = vsel %vm826_vm3, %v1415_v36, %v1417_v13  ;;  %v1522_v32 = vsel %vm931_vm2, %v1519_v30, %v1521_v51 }
 0x153   : > { %v722_v55 = vpop.f32.mrf.mxu2  ;;  %v1137_v38 = vpop.f32.mrf.mxu3  ;;  %1455 = vrot.lane.b32.xlu2 %v1418_v52, %s2183_s6  ;;  %1559 = vrot.lane.b32.xlu0 %v1522_v32, %s2182_s5 }
 0x156   : > { %v1223_v23 = vpop.f32.mrf.mxu0  ;;  %v1307_v0 = vpop.f32.mrf.mxu1 }
 0x158   : > { %2013 = vmatmul.msk.bf16.gmra.mxu2 %vm444_vm1, %v2380_v28  ;;  %2032 = vmatmul.msk.bf16.gmra.mxu3 %vm444_vm1, %v2344_v24 }
 0x159   : > { %873 = vrot.lane.b32.xlu1 %v836_v2, %s2183_s6 }
 0x15a   : > { %2048 = vmatmul.msk.bf16.gmra.mxu0 %vm444_vm1, %v2316_v20  ;;  %2064 = vmatmul.msk.bf16.gmra.mxu1 %vm444_vm1, %v2380_v28 }
 0x15b   : > { %v724_v4 = vpop.f32.mrf.mxu2  ;;  %v1139_v25 = vpop.f32.mrf.mxu3 }
 0x15c   : > { %v1224_v15 = vadd.f32 %v1223_v23, %v1139_v25  ;;  %v2623_v54 = vadd.f32 %v724_v4, %v2456_v14 }
 0x15e   : > { %v1225_v62 = vpop.f32.mrf.mxu0  ;;  %v1309_v11 = vpop.f32.mrf.mxu1  ;;  %v2625_v18 = vadd.f32 %v1307_v0, %v1224_v15  ;;  %v837_v31 = vrot.slane %v2623_v54, 1  ;;  %v942_v38 = vrot.slane %v2623_v54, 2  ;;  %v2091_v15 = vld [vmem:[%s2377_s30 + $0x10] sm:$0xff] }
 0x160   : > { %v1419_v39 = vrot.slane %v2625_v18, 1  ;;  %v1523_v14 = vrot.slane %v2625_v18, 2 }
 0x161   : > { %978 = vrot.lane.b32.xlu1 %v941_v60, %s2182_s5 }
 0x163   : > { %v726_v30 = vpop.f32.mrf.mxu2  ;;  %v1141_v20 = vpop.f32.mrf.mxu3 }
 0x164   : > { %v2628_v27 = vadd.f32 %v726_v30, %v2468_v33  ;;  %v1226_v17 = vadd.f32 %v1225_v62, %v1141_v20 }
 0x166   : > { %v838_v34 = vrot.slane %v2628_v27, 1  ;;  %v2632_v36 = vadd.f32 %v1309_v11, %v1226_v17  ;;  %v1228_v10 = vpop.f32.mrf.mxu0  ;;  %v1312_v44 = vpop.f32.mrf.mxu1  ;;  %v943_v52 = vrot.slane %v2628_v27, 2 }
 0x168   : > { %v1420_v21 = vrot.slane %v2632_v36, 1  ;;  %v1524_v43 = vrot.slane %v2632_v36, 2  ;;  %2014 = vmatmul.msk.bf16.gmra.mxu2 %vm444_vm1, %v2391_v29  ;;  %2033 = vmatmul.msk.bf16.gmra.mxu3 %vm444_vm1, %v2359_v26  ;;  %v839_v33 = vsel %vm826_vm3, %v837_v31, %v838_v34  ;;  %v944_v4 = vsel %vm931_vm2, %v942_v38, %v943_v52 }
 0x169   : > { %875 = vrot.lane.b32.xlu2 %v839_v33, %s2183_s6 }
 0x16a   : > { %v1525_v49 = vsel %vm931_vm2, %v1523_v14, %v1524_v43  ;;  %v1421_v13 = vsel %vm826_vm3, %v1419_v39, %v1420_v21  ;;  %2049 = vmatmul.msk.bf16.gmra.mxu0 %vm444_vm1, %v2330_v22  ;;  %2065 = vmatmul.msk.bf16.gmra.mxu1 %vm444_vm1, %v2391_v29 }
 0x16b   : > { %v729_v51 = vpop.f32.mrf.mxu2  ;;  %v1144_v16 = vpop.f32.mrf.mxu3  ;;  %1561 = vrot.lane.b32.xlu1 %v1525_v49, %s2182_s5  ;;  %1457 = vrot.lane.b32.xlu0 %v1421_v13, %s2183_s6 }
 0x16c   : > { %v786_v32 = vadd.f32 %v729_v51, %v2472_v42  ;;  %v1229_v55 = vadd.f32 %v1228_v10, %v1144_v16  ;;  %v2092_v51 = vld [vmem:[%s2377_s30 + $0x18] sm:$0xff] }
 0x16e   : > { %v945_v58 = vrot.slane %v786_v32, 2  ;;  %v1369_v23 = vadd.f32 %v1312_v44, %v1229_v55  ;;  %v1230_v22 = vpop.f32.mrf.mxu0  ;;  %v1314_v0 = vpop.f32.mrf.mxu1  ;;  %v840_v42 = vrot.slane %v786_v32, 1 }
 0x170   : > { %v1422_v2 = vrot.slane %v1369_v23, 1  ;;  %v946_v7 = vsel %vm931_vm2, %v943_v52, %v945_v58  ;;  %v841_v20 = vsel %vm826_vm3, %v838_v34, %v840_v42  ;;  %v1526_v10 = vrot.slane %v1369_v23, 2 }
 0x171   : > { %980 = vrot.lane.b32.xlu2 %v944_v4, %s2182_s5 }
 0x172   : > { %v1423_v25 = vsel %vm826_vm3, %v1420_v21, %v1422_v2  ;;  %v1527_v21 = vsel %vm931_vm2, %v1524_v43, %v1526_v10 }
 0x173   : > { %v731_v62 = vpop.f32.mrf.mxu2  ;;  %v1146_v11 = vpop.f32.mrf.mxu3  ;;  %1459 = vrot.lane.b32.xlu1 %v1423_v25, %s2183_s6  ;;  %982 = vrot.lane.b32.xlu0 %v946_v7, %s2182_s5 }
 0x176   : > { %v1232_v60 = vpop.f32.mrf.mxu0  ;;  %v1316_v30 = vpop.f32.mrf.mxu1 }
 0x178   : > { %2015 = vmatmul.msk.bf16.gmra.mxu2 %vm444_vm1, %v2091_v15  ;;  %2034 = vmatmul.msk.bf16.gmra.mxu3 %vm444_vm1, %v2380_v28 }
 0x179   : > { %877 = vrot.lane.b32.xlu2 %v841_v20, %s2183_s6 }
 0x17a   : > { %2050 = vmatmul.msk.bf16.gmra.mxu0 %vm444_vm1, %v2344_v24  ;;  %2066 = vmatmul.msk.bf16.gmra.mxu1 %vm444_vm1, %v2091_v15 }
 0x17b   : > { %v733_v17 = vpop.f32.mrf.mxu2  ;;  %v1148_v31 = vpop.f32.mrf.mxu3 }
 0x17c   : > { %v1233_v14 = vadd.f32 %v1232_v60, %v1148_v31  ;;  %v2672_v28 = vadd.f32 %v733_v17, %v2484_v53 }
 0x17e   : > { %v1234_v44 = vpop.f32.mrf.mxu0  ;;  %v1318_v39 = vpop.f32.mrf.mxu1  ;;  %v2675_v49 = vadd.f32 %v1316_v30, %v1233_v14  ;;  %v842_v16 = vrot.slane %v2672_v28, 1  ;;  %v947_v52 = vrot.slane %v2672_v28, 2 }
 0x180   : > { %v1424_v58 = vrot.slane %v2675_v49, 1  ;;  %v1528_v62 = vrot.slane %v2675_v49, 2 }
 0x181   : > { %1563 = vrot.lane.b32.xlu2 %v1527_v21, %s2182_s5 }
 0x183   : > { %v735_v34 = vpop.f32.mrf.mxu2  ;;  %v1150_v33 = vpop.f32.mrf.mxu3 }
 0x184   : > { %v2678_v24 = vadd.f32 %v735_v34, %v2496_v61  ;;  %v1235_v13 = vadd.f32 %v1234_v44, %v1150_v33 }
 0x186   : > { %v843_v43 = vrot.slane %v2678_v24, 1  ;;  %v948_v53 = vrot.slane %v2678_v24, 2  ;;  %v2685_v32 = vadd.f32 %v1318_v39, %v1235_v13  ;;  %v1237_v55 = vpop.f32.mrf.mxu0  ;;  %v1321_v38 = vpop.f32.mrf.mxu1 }
 0x188   : > { %v1425_v23 = vrot.slane %v2685_v32, 1  ;;  %2016 = vmatmul.msk.bf16.gmra.mxu2 %vm444_vm1, %v2092_v51  ;;  %2035 = vmatmul.msk.bf16.gmra.mxu3 %vm444_vm1, %v2391_v29  ;;  %v949_v61 = vsel %vm931_vm2, %v947_v52, %v948_v53  ;;  %v844_v22 = vsel %vm826_vm3, %v842_v16, %v843_v43  ;;  %v1529_v29 = vrot.slane %v2685_v32, 2  ;;  %v2720_v52 = vld [vmem:[%s3061_s3] ss:$0 sm:$0xff] }
 0x189   : > { %984 = vrot.lane.b32.xlu1 %v949_v61, %s2182_s5  ;;  %879 = vrot.lane.b32.xlu0 %v844_v22, %s2183_s6 }
 0x18a   : > { %v1426_v0 = vsel %vm826_vm3, %v1424_v58, %v1425_v23  ;;  %2051 = vmatmul.msk.bf16.gmra.mxu0 %vm444_vm1, %v2359_v26  ;;  %2067 = vmatmul.msk.bf16.gmra.mxu1 %vm444_vm1, %v2092_v51  ;;  %v1530_v20 = vsel %vm931_vm2, %v1528_v62, %v1529_v29  ;;  %v1450_v58 = vpop.permute.xlu2 %1449 }
 0x18b   : > { %v738_v2 = vpop.f32.mrf.mxu2  ;;  %v1153_v4 = vpop.f32.mrf.mxu3  ;;  %1461 = vrot.lane.b32.xlu2 %v1426_v0, %s2183_s6  ;;  %v1497_v0 = vadd.f32 %v1450_v58, %v2523_v46 }
 0x18c   : > { %v789_v25 = vadd.f32 %v738_v2, %v2500_v6  ;;  %v1238_v7 = vadd.f32 %v1237_v55, %v1153_v4 }
 0x18e   : > { %v845_v11 = vrot.slane %v789_v25, 1  ;;  %v950_v42 = vrot.slane %v789_v25, 2  ;;  %v1239_v15 = vpop.f32.mrf.mxu0  ;;  %v1323_v60 = vpop.f32.mrf.mxu1  ;;  %v1372_v26 = vadd.f32 %v1321_v38, %v1238_v7 }
 0x190   : > { %v846_v30 = vsel %vm826_vm3, %v843_v43, %v845_v11  ;;  %v951_v6 = vsel %vm931_vm2, %v948_v53, %v950_v42  ;;  %v1427_v10 = vrot.slane %v1372_v26, 1  ;;  %v1531_v44 = vrot.slane %v1372_v26, 2 }
 0x191   : > { %881 = vrot.lane.b32.xlu1 %v846_v30, %s2183_s6  ;;  %1565 = vrot.lane.b32.xlu0 %v1530_v20, %s2182_s5 }
 0x192   : > { %v1532_v21 = vsel %vm931_vm2, %v1529_v29, %v1531_v44  ;;  %v1428_v34 = vsel %vm826_vm3, %v1425_v23, %v1427_v10  ;;  %v975_v10 = vpop.permute.xlu2 %974 }
 0x193   : > { %v740_v17 = vpop.f32.mrf.mxu2  ;;  %v1155_v31 = vpop.f32.mrf.mxu3  ;;  %986 = vrot.lane.b32.xlu2 %v951_v6, %s2182_s5 }
 0x196   : > { %v1241_v39 = vpop.f32.mrf.mxu0  ;;  %v1325_v14 = vpop.f32.mrf.mxu1 }
 0x199   : > { %1567 = vrot.lane.b32.xlu1 %v1532_v21, %s2182_s5  ;;  %1463 = vrot.lane.b32.xlu0 %v1428_v34, %s2183_s6 }
 0x19b   : > { %v742_v33 = vpop.f32.mrf.mxu2  ;;  %v1157_v13 = vpop.f32.mrf.mxu3 }
 0x19c   : > { %v868_v51 = vpop.permute.xlu0 %867  ;;  %v973_v16 = vpop.permute.xlu1 %972  ;;  %v1242_v23 = vadd.f32 %v1241_v39, %v1157_v13  ;;  %v2724_v61 = vadd.f32 %v742_v33, %v2410_v35 }
 0x19d   : > { %v915_v43 = vadd.f32 %v868_v51, %v2521_v40 }
 0x19e   : > { %v1243_v53 = vpop.f32.mrf.mxu0  ;;  %v1327_v55 = vpop.f32.mrf.mxu1  ;;  %v2728_v25 = vadd.f32 %v1325_v14, %v1242_v23  ;;  %v847_v35 = vrot.slane %v2724_v61, 1  ;;  %v952_v42 = vrot.slane %v2724_v61, 2 }
 0x19f   : > { %v1020_v38 = vadd.f32 %v973_v16, %v915_v43 }
 0x1a0   : > { %v1429_v20 = vrot.slane %v2728_v25, 1  ;;  %v1533_v16 = vrot.slane %v2728_v25, 2 }
 0x1a1   : > { %v1040_v22 = vadd.f32 %v2720_v52, %v1020_v38 }
 0x1a3   : > { %v1056_v2 = vmax.f32 %v1040_v22, 0.0  ;;  %v744_v4 = vpop.f32.mrf.mxu2  ;;  %v1159_v29 = vpop.f32.mrf.mxu3 }
 0x1a4   : > { %v2731_v40 = vadd.f32 %v744_v4, %v2414_v41  ;;  %v1244_v7 = vadd.f32 %v1243_v53, %v1159_v29  ;;  %v1554_v62 = vpop.permute.xlu0 %1553 }
 0x1a5   : > { %v1072_v46 = vpack.c.bf16 %v1056_v2, %v1056_v2  ;;  %v2739_v11 = vadd.f32 %v1554_v62, %v1497_v0  ;;  %v1556_v62 = vpop.permute.xlu1 %1555 }
 0x1a6   : > { %v848_v15 = vrot.slane %v2731_v40, 1  ;;  %v953_v41 = vrot.slane %v2731_v40, 2  ;;  %v2744_v60 = vadd.f32 %v1327_v55, %v1244_v7 }
 0x1a7   : > { %v1246_v26 = vpop.f32.mrf.mxu0  ;;  %v1330_v30 = vpop.f32.mrf.mxu1  ;;  %1089 = vst.msk [vmem:[%s2736_s13] sm:$0xf] %vm1088_vm4, %v1072_v46 }
 0x1a8   : > { %v1430_v6 = vrot.slane %v2744_v60, 1  ;;  %v849_v17 = vsel %vm826_vm3, %v847_v35, %v848_v15  ;;  %v954_v31 = vsel %vm931_vm2, %v952_v42, %v953_v41  ;;  %v1534_v21 = vrot.slane %v2744_v60, 2 }
 0x1a9   : > { %883 = vrot.lane.b32.xlu2 %v849_v17, %s2183_s6  ;;  %988 = vrot.lane.b32.xlu0 %v954_v31, %s2182_s5 }
 0x1aa   : > { %v1431_v44 = vsel %vm826_vm3, %v1429_v20, %v1430_v6  ;;  %v1535_v22 = vsel %vm931_vm2, %v1533_v16, %v1534_v21 }
 0x1ab   : > { %v747_v39 = vpop.f32.mrf.mxu2  ;;  %v1162_v14 = vpop.f32.mrf.mxu3  ;;  %1465 = vrot.lane.b32.xlu1 %v1431_v44, %s2183_s6 }
 0x1ac   : > { %v792_v34 = vadd.f32 %v747_v39, %v2426_v47  ;;  %v1247_v33 = vadd.f32 %v1246_v26, %v1162_v14  ;;  %v870_v13 = vpop.permute.xlu0 %869  ;;  %v1558_v47 = vpop.permute.xlu2 %1557 }
 0x1ad   : > { %v916_v51 = vadd.f32 %v870_v13, %v2526_v48 }
 0x1ae   : > { %v850_v43 = vrot.slane %v792_v34, 1  ;;  %v955_v53 = vrot.slane %v792_v34, 2  ;;  %v1375_v23 = vadd.f32 %v1330_v30, %v1247_v33 }
 0x1af   : > { %v1021_v55 = vadd.f32 %v975_v10, %v916_v51  ;;  %v1248_v38 = vpop.f32.mrf.mxu0  ;;  %v1332_v58 = vpop.f32.mrf.mxu1 }
 0x1b0   : > { %v851_v0 = vsel %vm826_vm3, %v848_v15, %v850_v43  ;;  %v956_v48 = vsel %vm931_vm2, %v953_v41, %v955_v53  ;;  %v1432_v35 = vrot.slane %v1375_v23, 1  ;;  %v1536_v46 = vrot.slane %v1375_v23, 2 }
 0x1b1   : > { %v1041_v2 = vadd.f32 %v2720_v52, %v1021_v55  ;;  %1569 = vrot.lane.b32.xlu2 %v1535_v22, %s2182_s5  ;;  %885 = vrot.lane.b32.xlu0 %v851_v0, %s2183_s6 }
 0x1b2   : > { %v1433_v41 = vsel %vm826_vm3, %v1430_v6, %v1432_v35  ;;  %v1537_v31 = vsel %vm931_vm2, %v1534_v21, %v1536_v46 }
 0x1b3   : > { %v1057_v4 = vmax.f32 %v1041_v2, 0.0  ;;  %v749_v29 = vpop.f32.mrf.mxu2  ;;  %v1164_v7 = vpop.f32.mrf.mxu3  ;;  %990 = vrot.lane.b32.xlu1 %v956_v48, %s2182_s5 }
 0x1b4   : > { %v1452_v42 = vpop.permute.xlu0 %1451  ;;  %v1456_v39 = vpop.permute.xlu2 %1455 }
 0x1b5   : > { %v1073_v15 = vpack.c.bf16 %v1057_v4, %v1057_v4  ;;  %v1498_v26 = vadd.f32 %v1452_v42, %v2529_v50  ;;  %v1500_v38 = vadd.f32 %v1456_v39, %v2581_v9 }
 0x1b7   : > { %v2768_v30 = vadd.f32 %v1556_v62, %v1498_v26  ;;  %v1250_v20 = vpop.f32.mrf.mxu0  ;;  %v1334_v17 = vpop.f32.mrf.mxu1  ;;  %1090 = vst.msk [vmem:[%s2736_s13 + $0x4] sm:$0xf] %vm1088_vm4, %v1073_v15 }
 0x1b9   : > { %1467 = vrot.lane.b32.xlu2 %v1433_v41, %s2183_s6  ;;  %1571 = vrot.lane.b32.xlu0 %v1537_v31, %s2182_s5 }
 0x1bb   : > { %v751_v10 = vpop.f32.mrf.mxu2  ;;  %v1166_v44 = vpop.f32.mrf.mxu3 }
 0x1bc   : > { %v872_v14 = vpop.permute.xlu1 %871  ;;  %v977_v34 = vpop.permute.xlu0 %976  ;;  %v1251_v16 = vadd.f32 %v1250_v20, %v1166_v44  ;;  %v2778_v43 = vadd.f32 %v751_v10, %v2438_v57 }
 0x1bd   : > { %v917_v50 = vadd.f32 %v872_v14, %v2571_v59 }
 0x1be   : > { %v2782_v58 = vadd.f32 %v1334_v17, %v1251_v16  ;;  %v957_v2 = vrot.slane %v2778_v43, 2 }
 0x1bf   : > { %v1022_v33 = vadd.f32 %v977_v34, %v917_v50  ;;  %v1252_v13 = vpop.f32.mrf.mxu0  ;;  %v1336_v51 = vpop.f32.mrf.mxu1 }
 0x1c0   : > { %v1434_v15 = vrot.slane %v2782_v58, 1 }
 0x1c1   : > { %v1042_v6 = vadd.f32 %v2720_v52, %v1022_v33 }
 0x1c3   : > { %v1058_v21 = vmax.f32 %v1042_v6, 0.0  ;;  %v753_v53 = vpop.f32.mrf.mxu2  ;;  %v1168_v55 = vpop.f32.mrf.mxu3 }
 0x1c4   : > { %v2785_v23 = vadd.f32 %v753_v53, %v2442_v63  ;;  %v1253_v59 = vadd.f32 %v1252_v13, %v1168_v55  ;;  %v876_v22 = vpop.permute.xlu2 %875  ;;  %v1454_v0 = vpop.permute.xlu1 %1453  ;;  %v852_v63 = vrot.slane %v2778_v43, 1 }
 0x1c5   : > { %v1074_v57 = vpack.c.bf16 %v1058_v21, %v1058_v21  ;;  %v1499_v48 = vadd.f32 %v1454_v0, %v2574_v3  ;;  %v1560_v4 = vpop.permute.xlu0 %1559 }
 0x1c6   : > { %v853_v29 = vrot.slane %v2785_v23, 1  ;;  %v958_v7 = vrot.slane %v2785_v23, 2  ;;  %v2791_v9 = vadd.f32 %v1336_v51, %v1253_v59  ;;  %v2793_v62 = vadd.f32 %v1560_v4, %v1500_v38 }
 0x1c7   : > { %v2796_v35 = vadd.f32 %v1558_v47, %v1499_v48  ;;  %v1255_v46 = vpop.f32.mrf.mxu0  ;;  %v1339_v42 = vpop.f32.mrf.mxu1  ;;  %1091 = vst.msk [vmem:[%s2736_s13 + $0x8] sm:$0xf] %vm1088_vm4, %v1074_v57  ;;  %v919_v47 = vadd.f32 %v876_v22, %v2623_v54  ;;  %v1538_v51 = vrot.slane %v2782_v58, 2 }
 0x1c8   : > { %v1435_v3 = vrot.slane %v2791_v9, 1  ;;  %v959_v26 = vsel %vm931_vm2, %v957_v2, %v958_v7  ;;  %v854_v20 = vsel %vm826_vm3, %v852_v63, %v853_v29  ;;  %v1539_v50 = vrot.slane %v2791_v9, 2 }
 0x1c9   : > { %992 = vrot.lane.b32.xlu2 %v959_v26, %s2182_s5  ;;  %887 = vrot.lane.b32.xlu1 %v854_v20, %s2183_s6 }
 0x1ca   : > { %v1436_v17 = vsel %vm826_vm3, %v1434_v15, %v1435_v3 }
 0x1cb   : > { %v756_v41 = vpop.f32.mrf.mxu2  ;;  %v1171_v31 = vpop.f32.mrf.mxu3  ;;  %1469 = vrot.lane.b32.xlu0 %v1436_v17, %s2183_s6 }
 0x1cc   : > { %v795_v10 = vadd.f32 %v756_v41, %v2454_v5  ;;  %v1256_v44 = vadd.f32 %v1255_v46, %v1171_v31  ;;  %v981_v39 = vpop.permute.xlu2 %980  ;;  %v874_v14 = vpop.permute.xlu1 %873  ;;  %v1540_v5 = vsel %vm931_vm2, %v1538_v51, %v1539_v50 }
 0x1cd   : > { %v1024_v34 = vadd.f32 %v981_v39, %v919_v47  ;;  %v918_v22 = vadd.f32 %v874_v14, %v2577_v12 }
 0x1ce   : > { %v855_v33 = vrot.slane %v795_v10, 1  ;;  %v960_v13 = vrot.slane %v795_v10, 2  ;;  %v1378_v21 = vadd.f32 %v1339_v42, %v1256_v44 }
 0x1cf   : > { %v1044_v16 = vadd.f32 %v2720_v52, %v1024_v34  ;;  %v1257_v6 = vpop.f32.mrf.mxu0  ;;  %v1341_v54 = vpop.f32.mrf.mxu1 }
 0x1d0   : > { %v856_v53 = vsel %vm826_vm3, %v853_v29, %v855_v33  ;;  %v961_v38 = vsel %vm931_vm2, %v958_v7, %v960_v13  ;;  %v1541_v57 = vrot.slane %v1378_v21, 2  ;;  %v1437_v4 = vrot.slane %v1378_v21, 1 }
 0x1d1   : > { %v1060_v55 = vmax.f32 %v1044_v16, 0.0  ;;  %889 = vrot.lane.b32.xlu2 %v856_v53, %s2183_s6  ;;  %1573 = vrot.lane.b32.xlu1 %v1540_v5, %s2182_s5 }
 0x1d2   : > { %v1542_v7 = vsel %vm931_vm2, %v1539_v50, %v1541_v57  ;;  %v1438_v12 = vsel %vm826_vm3, %v1435_v3, %v1437_v4 }
 0x1d3   : > { %v1076_v59 = vpack.c.bf16 %v1060_v55, %v1060_v55  ;;  %v758_v0 = vpop.f32.mrf.mxu2  ;;  %v1173_v2 = vpop.f32.mrf.mxu3  ;;  %994 = vrot.lane.b32.xlu0 %v961_v38, %s2182_s5 }
 0x1d4   : > { %v979_v48 = vpop.permute.xlu1 %978  ;;  %v878_v39 = vpop.permute.xlu2 %877 }
 0x1d5   : > { %v1023_v29 = vadd.f32 %v979_v48, %v918_v22  ;;  %1093 = vst.msk [vmem:[%s2736_s13 + $0x10] sm:$0xf] %vm1088_vm4, %v1076_v59  ;;  %v920_v13 = vadd.f32 %v878_v39, %v2628_v27 }
 0x1d7   : > { %v1043_v63 = vadd.f32 %v2720_v52, %v1023_v29  ;;  %v1259_v46 = vpop.f32.mrf.mxu0  ;;  %v1343_v42 = vpop.f32.mrf.mxu1 }
 0x1d9   : > { %v1059_v15 = vmax.f32 %v1043_v63, 0.0  ;;  %1575 = vrot.lane.b32.xlu2 %v1542_v7, %s2182_s5  ;;  %1471 = vrot.lane.b32.xlu1 %v1438_v12, %s2183_s6 }
 0x1db   : > { %v1075_v26 = vpack.c.bf16 %v1059_v15, %v1059_v15  ;;  %v760_v20 = vpop.f32.mrf.mxu2  ;;  %v1175_v17 = vpop.f32.mrf.mxu3 }
 0x1dc   : > { %v1260_v10 = vadd.f32 %v1259_v46, %v1175_v17  ;;  %v2832_v44 = vadd.f32 %v760_v20, %v2466_v19 }
 0x1dd   : > { %v2827_v47 = vpop.permute.xlu0 %1457  ;;  %1092 = vst.msk [vmem:[%s2736_s13 + $0xc] sm:$0xf] %vm1088_vm4, %v1075_v26  ;;  %v2853_v0 = vpop.permute.xlu1 %1561 }
 0x1de   : > { %v2834_v34 = vadd.f32 %v1343_v42, %v1260_v10  ;;  %v857_v51 = vrot.slane %v2832_v44, 1  ;;  %v962_v16 = vrot.slane %v2832_v44, 2 }
 0x1df   : > { %v1261_v41 = vpop.f32.mrf.mxu0  ;;  %v1345_v31 = vpop.f32.mrf.mxu1 }
 0x1e0   : > { %v1543_v7 = vrot.slane %v2834_v34, 2 }
 0x1e3   : > { %v762_v14 = vpop.f32.mrf.mxu2  ;;  %v1177_v50 = vpop.f32.mrf.mxu3 }
 0x1e4   : > { %v2837_v3 = vadd.f32 %v762_v14, %v2470_v37  ;;  %v1262_v33 = vadd.f32 %v1261_v41, %v1177_v50  ;;  %v1439_v37 = vrot.slane %v2834_v34, 1 }
 0x1e5   : > { %v983_v21 = vpop.permute.xlu0 %982  ;;  %v2870_v50 = vpop.permute.xlu1 %1459 }
 0x1e6   : > { %v858_v6 = vrot.slane %v2837_v3, 1  ;;  %v963_v19 = vrot.slane %v2837_v3, 2  ;;  %v2844_v54 = vadd.f32 %v1345_v31, %v1262_v33  ;;  %v1025_v53 = vadd.f32 %v983_v21, %v920_v13 }
 0x1e7   : > { %v1264_v55 = vpop.f32.mrf.mxu0  ;;  %v1348_v5 = vpop.f32.mrf.mxu1 }
 0x1e8   : > { %v1440_v38 = vrot.slane %v2844_v54, 1  ;;  %v964_v27 = vsel %vm931_vm2, %v962_v16, %v963_v19  ;;  %v859_v59 = vsel %vm826_vm3, %v857_v51, %v858_v6  ;;  %v1045_v22 = vadd.f32 %v2720_v52, %v1025_v53 }
 0x1e9   : > { %996 = vrot.lane.b32.xlu1 %v964_v27, %s2182_s5  ;;  %891 = vrot.lane.b32.xlu0 %v859_v59, %s2183_s6  ;;  %v1544_v29 = vrot.slane %v2844_v54, 2 }
 0x1ea   : > { %v1441_v2 = vsel %vm826_vm3, %v1439_v37, %v1440_v38  ;;  %v1061_v57 = vmax.f32 %v1045_v22, 0.0 }
 0x1eb   : > { %v765_v48 = vpop.f32.mrf.mxu2  ;;  %v1180_v4 = vpop.f32.mrf.mxu3  ;;  %1473 = vrot.lane.b32.xlu2 %v1441_v2, %s2183_s6  ;;  %v1545_v31 = vsel %vm931_vm2, %v1543_v7, %v1544_v29 }
 0x1ec   : > { %v798_v63 = vadd.f32 %v765_v48, %v2482_v45  ;;  %v1265_v46 = vadd.f32 %v1264_v55, %v1180_v4  ;;  %v1077_v42 = vpack.c.bf16 %v1061_v57, %v1061_v57  ;;  %v2866_v45 = vpop.permute.xlu2 %1563 }
 0x1ee   : > { %v860_v15 = vrot.slane %v798_v63, 1  ;;  %v965_v12 = vrot.slane %v798_v63, 2  ;;  %1094 = vst.msk [vmem:[%s2736_s13 + $0x14] sm:$0xf] %vm1088_vm4, %v1077_v42  ;;  %v1381_v17 = vadd.f32 %v1348_v5, %v1265_v46 }
 0x1ef   : > { %v1266_v26 = vpop.f32.mrf.mxu0  ;;  %v1350_v20 = vpop.f32.mrf.mxu1 }
 0x1f0   : > { %v861_v41 = vsel %vm826_vm3, %v858_v6, %v860_v15  ;;  %v966_v10 = vsel %vm931_vm2, %v963_v19, %v965_v12  ;;  %v1442_v33 = vrot.slane %v1381_v17, 1  ;;  %v1546_v13 = vrot.slane %v1381_v17, 2 }
 0x1f1   : > { %893 = vrot.lane.b32.xlu1 %v861_v41, %s2183_s6  ;;  %1577 = vrot.lane.b32.xlu0 %v1545_v31, %s2182_s5 }
 0x1f2   : > { %v1547_v6 = vsel %vm931_vm2, %v1544_v29, %v1546_v13  ;;  %v1443_v21 = vsel %vm826_vm3, %v1440_v38, %v1442_v33 }
 0x1f3   : > { %v767_v39 = vpop.f32.mrf.mxu2  ;;  %v1182_v14 = vpop.f32.mrf.mxu3  ;;  %998 = vrot.lane.b32.xlu2 %v966_v10, %s2182_s5 }
 0x1f4   : > { %v2876_v53 = vpop.permute.xlu2 %1461 }
 0x1f7   : > { %v1268_v51 = vpop.f32.mrf.mxu0  ;;  %v1352_v16 = vpop.f32.mrf.mxu1 }
 0x1f9   : > { %1579 = vrot.lane.b32.xlu1 %v1547_v6, %s2182_s5  ;;  %1475 = vrot.lane.b32.xlu0 %v1443_v21, %s2183_s6 }
 0x1fb   : > { %v769_v19 = vpop.f32.mrf.mxu2  ;;  %v1184_v55 = vpop.f32.mrf.mxu3 }
 0x1fc   : > { %v985_v5 = vpop.permute.xlu1 %984  ;;  %v880_v37 = vpop.permute.xlu0 %879  ;;  %v1269_v57 = vadd.f32 %v1268_v51, %v1184_v55  ;;  %v2881_v38 = vadd.f32 %v769_v19, %v2494_v56 }
 0x1fd   : > { %v921_v27 = vadd.f32 %v880_v37, %v2672_v28  ;;  %v987_v26 = vpop.permute.xlu2 %986 }
 0x1fe   : > { %v2883_v46 = vadd.f32 %v1352_v16, %v1269_v57  ;;  %v862_v20 = vrot.slane %v2881_v38, 1  ;;  %v967_v31 = vrot.slane %v2881_v38, 2 }
 0x1ff   : > { %v1026_v59 = vadd.f32 %v985_v5, %v921_v27  ;;  %v1270_v22 = vpop.f32.mrf.mxu0  ;;  %v1354_v2 = vpop.f32.mrf.mxu1  ;;  %v2910_v27 = vld [vmem:[%s3061_s3 + $0x1] ss:$0 sm:$0xff] }
 0x200   : > { %v1444_v14 = vrot.slane %v2883_v46, 1 }
 0x201   : > { %v1046_v48 = vadd.f32 %v2720_v52, %v1026_v59 }
 0x203   : > { %v1062_v4 = vmax.f32 %v1046_v48, 0.0  ;;  %v771_v29 = vpop.f32.mrf.mxu2  ;;  %v1186_v63 = vpop.f32.mrf.mxu3 }
 0x204   : > { %v2886_v42 = vadd.f32 %v771_v29, %v2498_v1  ;;  %v1271_v7 = vadd.f32 %v1270_v22, %v1186_v63  ;;  %v882_v28 = vpop.permute.xlu1 %881  ;;  %v1566_v33 = vpop.permute.xlu0 %1565 }
 0x205   : > { %v1078_v15 = vpack.c.bf16 %v1062_v4, %v1062_v4  ;;  %v922_v12 = vadd.f32 %v882_v28, %v2678_v24 }
 0x206   : > { %v863_v56 = vrot.slane %v2886_v42, 1  ;;  %v968_v17 = vrot.slane %v2886_v42, 2  ;;  %v2892_v41 = vadd.f32 %v1354_v2, %v1271_v7  ;;  %v884_v7 = vpop.permute.xlu2 %883 }
 0x207   : > { %v1027_v10 = vadd.f32 %v987_v26, %v922_v12  ;;  %v1273_v39 = vpop.f32.mrf.mxu0  ;;  %v1357_v1 = vpop.f32.mrf.mxu1  ;;  %1095 = vst.msk [vmem:[%s2736_s13 + $0x18] sm:$0xf] %vm1088_vm4, %v1078_v15 }
 0x208   : > { %v1445_v24 = vrot.slane %v2892_v41, 1  ;;  %v864_v13 = vsel %vm826_vm3, %v862_v20, %v863_v56  ;;  %v969_v16 = vsel %vm931_vm2, %v967_v31, %v968_v17 }
 0x209   : > { %v1047_v51 = vadd.f32 %v2720_v52, %v1027_v10  ;;  %895 = vrot.lane.b32.xlu2 %v864_v13, %s2183_s6  ;;  %1000 = vrot.lane.b32.xlu0 %v969_v16, %s2182_s5  ;;  %v1625_v13 = vadd.f32 %v2910_v27, %v2793_v62 }
 0x20a   : > { %v1446_v6 = vsel %vm826_vm3, %v1444_v14, %v1445_v24  ;;  %v1548_v14 = vrot.slane %v2883_v46, 2 }
 0x20b   : > { %v1063_v21 = vmax.f32 %v1047_v51, 0.0  ;;  %v774_v19 = vpop.f32.mrf.mxu2  ;;  %v1189_v55 = vpop.f32.mrf.mxu3  ;;  %1477 = vrot.lane.b32.xlu1 %v1446_v6, %s2183_s6  ;;  %v1501_v51 = vadd.f32 %v2827_v47, %v2625_v18  ;;  %v923_v6 = vadd.f32 %v884_v7, %v2724_v61 }
 0x20c   : > { %v801_v5 = vadd.f32 %v774_v19, %v2510_v8  ;;  %v1274_v37 = vadd.f32 %v1273_v39, %v1189_v55  ;;  %v1622_v8 = vadd.f32 %v2910_v27, %v2739_v11  ;;  %v1464_v28 = vpop.permute.xlu0 %1463  ;;  %v1549_v39 = vrot.slane %v2892_v41, 2 }
 0x20d   : > { %v1079_v59 = vpack.c.bf16 %v1063_v21, %v1063_v21  ;;  %v1623_v11 = vadd.f32 %v2910_v27, %v2768_v30  ;;  %v1641_v21 = vmax.f32 %v1625_v13, 0.0  ;;  %v1605_v61 = vadd.f32 %v2853_v0, %v1501_v51 }
 0x20e   : > { %v865_v22 = vrot.slane %v801_v5, 1  ;;  %v970_v2 = vrot.slane %v801_v5, 2  ;;  %v1384_v57 = vadd.f32 %v1357_v1, %v1274_v37  ;;  %v1638_v31 = vmax.f32 %v1622_v8, 0.0  ;;  %v1570_v55 = vpop.permute.xlu2 %1569 }
 0x20f   : > { %v1275_v48 = vpop.f32.mrf.mxu0  ;;  %v1359_v4 = vpop.f32.mrf.mxu1  ;;  %1096 = vst.msk [vmem:[%s2736_s13 + $0x1c] sm:$0xf] %vm1088_vm4, %v1079_v59  ;;  %v1624_v1 = vadd.f32 %v2910_v27, %v2796_v35  ;;  %v1550_v30 = vsel %vm931_vm2, %v1548_v14, %v1549_v39  ;;  %v1639_v35 = vmax.f32 %v1623_v11, 0.0  ;;  %v1504_v0 = vadd.f32 %v1464_v28, %v2685_v32 }
 0x210   : > { %v1447_v29 = vrot.slane %v1384_v57, 1  ;;  %v866_v63 = vsel %vm826_vm3, %v863_v56, %v865_v22  ;;  %v971_v12 = vsel %vm931_vm2, %v968_v17, %v970_v2  ;;  %v1551_v10 = vrot.slane %v1384_v57, 2  ;;  %v1568_v56 = vpop.permute.xlu1 %1567 }
 0x211   : > { %897 = vrot.lane.b32.xlu0 %v866_v63, %s2183_s6  ;;  %v1502_v17 = vadd.f32 %v2870_v50, %v2632_v36  ;;  %v1503_v36 = vadd.f32 %v2876_v53, %v2675_v49  ;;  %v1640_v50 = vmax.f32 %v1624_v1, 0.0  ;;  %v1655_v49 = vpack.c.bf16 %v1639_v35, %v1639_v35 }
 0x212   : > { %v1448_v15 = vsel %vm826_vm3, %v1445_v24, %v1447_v29  ;;  %v1654_v24 = vpack.c.bf16 %v1638_v31, %v1638_v31  ;;  %v1552_v16 = vsel %vm931_vm2, %v1549_v39, %v1551_v10  ;;  %v1657_v57 = vpack.c.bf16 %v1641_v21, %v1641_v21 }
 0x213   : > { %v776_v26 = vpop.f32.mrf.mxu2  ;;  %v1191_v20 = vpop.f32.mrf.mxu3  ;;  %1479 = vrot.lane.b32.xlu2 %v1448_v15, %s2183_s6  ;;  %1002 = vrot.lane.b32.xlu1 %v971_v12, %s2182_s5  ;;  %v1606_v18 = vadd.f32 %v2866_v45, %v1502_v17  ;;  %v1607_v19 = vadd.f32 %v1566_v33, %v1503_v36  ;;  %v1656_v2 = vpack.c.bf16 %v1640_v50, %v1640_v50 }
 0x214   : > { %v1626_v45 = vadd.f32 %v2910_v27, %v1605_v61  ;;  %v1608_v7 = vadd.f32 %v1568_v56, %v1504_v0 }
 0x215   : > { %v1627_v53 = vadd.f32 %v2910_v27, %v1606_v18  ;;  %v1628_v48 = vadd.f32 %v2910_v27, %v1607_v19 }
 0x216   : > { %v1642_v12 = vmax.f32 %v1626_v45, 0.0  ;;  %v1468_v32 = vpop.permute.xlu2 %1467  ;;  %v1629_v39 = vadd.f32 %v2910_v27, %v1608_v7 }
 0x217   : > { %v1644_v8 = vmax.f32 %v1628_v48, 0.0 }
 0x218   : > { %v1658_v11 = vpack.c.bf16 %v1642_v12, %v1642_v12  ;;  %v1645_v13 = vmax.f32 %v1629_v39, 0.0 }
 0x219   : > { %1583 = vrot.lane.b32.xlu0 %v1552_v16, %s2182_s5  ;;  %v1660_v10 = vpack.c.bf16 %v1644_v8, %v1644_v8 }
 0x21b   : > { %1581 = vrot.lane.b32.xlu2 %v1550_v30, %s2182_s5  ;;  %1686 = vrot.lane.b32.xlu1 %v1654_v24, %s2184_s22  ;;  %v989_v62 = vpop.permute.xlu0 %988  ;;  %v1661_v30 = vpack.c.bf16 %v1645_v13, %v1645_v13 }
 0x21c   : > { %v1028_v47 = vadd.f32 %v989_v62, %v923_v6 }
 0x21d   : > { %v1466_v5 = vpop.permute.xlu1 %1465 }
 0x21e   : > { %v1048_v37 = vadd.f32 %v2720_v52, %v1028_v47  ;;  %v1505_v22 = vadd.f32 %v1466_v5, %v2728_v25  ;;  %v1643_v25 = vmax.f32 %v1627_v53, 0.0 }
 0x220   : > { %v1064_v59 = vmax.f32 %v1048_v37, 0.0  ;;  %v1609_v29 = vadd.f32 %v1570_v55, %v1505_v22  ;;  %v1659_v31 = vpack.c.bf16 %v1643_v25, %v1643_v25 }
 0x221   : > { %1690 = vrot.lane.b32.xlu0 %v1656_v2, %s2184_s22 }
 0x222   : > { %v1080_v33 = vpack.c.bf16 %v1064_v59, %v1064_v59  ;;  %v1630_v28 = vadd.f32 %v2910_v27, %v1609_v29 }
 0x223   : > { %1688 = vrot.lane.b32.xlu2 %v1655_v49, %s2184_s22  ;;  %1692 = vrot.lane.b32.xlu1 %v1657_v57, %s2184_s22  ;;  %v886_v4 = vpop.permute.xlu0 %885  ;;  %v993_v36 = vpop.permute.xlu2 %992 }
 0x224   : > { %v924_v63 = vadd.f32 %v886_v4, %v2731_v40  ;;  %1097 = vst.msk [vmem:[%s2736_s13 + $0x20] sm:$0xf] %vm1088_vm4, %v1080_v33  ;;  %v1506_v40 = vadd.f32 %v1468_v32, %v2744_v60  ;;  %v1646_v24 = vmax.f32 %v1630_v28, 0.0 }
 0x225   : > { %v991_v15 = vpop.permute.xlu1 %990 }
 0x226   : > { %v1029_v26 = vadd.f32 %v991_v15, %v924_v63  ;;  %v1662_v6 = vpack.c.bf16 %v1646_v24, %v1646_v24 }
 0x228   : > { %v1049_v20 = vadd.f32 %v2720_v52, %v1029_v26 }
 0x229   : > { %1696 = vrot.lane.b32.xlu0 %v1659_v31, %s2184_s22 }
 0x22a   : > { %v1065_v1 = vmax.f32 %v1049_v20, 0.0 }
 0x22b   : > { %1694 = vrot.lane.b32.xlu2 %v1658_v11, %s2184_s22  ;;  %1698 = vrot.lane.b32.xlu1 %v1660_v10, %s2184_s22  ;;  %v1572_v56 = vpop.permute.xlu0 %1571  ;;  %v890_v50 = vpop.permute.xlu2 %889 }
 0x22c   : > { %v1081_v17 = vpack.c.bf16 %v1065_v1, %v1065_v1  ;;  %v1610_v14 = vadd.f32 %v1572_v56, %v1506_v40  ;;  %v926_v55 = vadd.f32 %v890_v50, %v2785_v23 }
 0x22e   : > { %v1631_v51 = vadd.f32 %v2910_v27, %v1610_v14  ;;  %1098 = vst.msk [vmem:[%s2736_s13 + $0x24] sm:$0xf] %vm1088_vm4, %v1081_v17 }
 0x230   : > { %v1647_v16 = vmax.f32 %v1631_v51, 0.0 }
 0x231   : > { %1702 = vrot.lane.b32.xlu0 %v1662_v6, %s2184_s22 }
 0x232   : > { %v1663_v60 = vpack.c.bf16 %v1647_v16, %v1647_v16 }
 0x233   : > { %1700 = vrot.lane.b32.xlu2 %v1661_v30, %s2184_s22  ;;  %v1576_v45 = vpop.permute.xlu2 %1575 }
 0x234   : > { %1704 = vrot.lane.b32.xlu1 %v1663_v60, %s2184_s22 }
 0x23b   : > { %v888_v62 = vpop.permute.xlu1 %887 }
 0x23c   : > { %v925_v35 = vadd.f32 %v888_v62, %v2778_v43 }
 0x23d   : > { %v1470_v18 = vpop.permute.xlu0 %1469 }
 0x23e   : > { %v1030_v47 = vadd.f32 %v993_v36, %v925_v35  ;;  %v1507_v19 = vadd.f32 %v1470_v18, %v2782_v58 }
 0x240   : > { %v1050_v21 = vadd.f32 %v2720_v52, %v1030_v47 }
 0x242   : > { %v1066_v61 = vmax.f32 %v1050_v21, 0.0 }
 0x243   : > { %v1574_v5 = vpop.permute.xlu1 %1573 }
 0x244   : > { %v1082_v37 = vpack.c.bf16 %v1066_v61, %v1066_v61  ;;  %v1611_v49 = vadd.f32 %v1574_v5, %v1507_v19 }
 0x245   : > { %v995_v53 = vpop.permute.xlu0 %994  ;;  %v1474_v29 = vpop.permute.xlu2 %1473 }
 0x246   : > { %v1031_v59 = vadd.f32 %v995_v53, %v926_v55  ;;  %v1632_v22 = vadd.f32 %v2910_v27, %v1611_v49  ;;  %1099 = vst.msk [vmem:[%s2736_s13 + $0x28] sm:$0xf] %vm1088_vm4, %v1082_v37  ;;  %v1509_v28 = vadd.f32 %v1474_v29, %v2834_v34 }
 0x248   : > { %v1051_v43 = vadd.f32 %v2720_v52, %v1031_v59  ;;  %v1648_v2 = vmax.f32 %v1632_v22, 0.0 }
 0x24a   : > { %v1067_v57 = vmax.f32 %v1051_v43, 0.0  ;;  %v1664_v48 = vpack.c.bf16 %v1648_v2, %v1648_v2 }
 0x24b   : > { %v1472_v58 = vpop.permute.xlu1 %1471 }
 0x24c   : > { %v1083_v0 = vpack.c.bf16 %v1067_v57, %v1067_v57  ;;  %v1508_v23 = vadd.f32 %v1472_v58, %v2791_v9  ;;  %1706 = vrot.lane.b32.xlu2 %v1664_v48, %s2184_s22 }
 0x24d   : > { %v999_v12 = vpop.permute.xlu2 %998 }
 0x24e   : > { %1100 = vst.msk [vmem:[%s2736_s13 + $0x2c] sm:$0xf] %vm1088_vm4, %v1083_v0  ;;  %v1612_v33 = vadd.f32 %v1576_v45, %v1508_v23 }
 0x250   : > { %v1633_v4 = vadd.f32 %v2910_v27, %v1612_v33 }
 0x252   : > { %v1649_v63 = vmax.f32 %v1633_v4, 0.0 }
 0x254   : > { %v1665_v25 = vpack.c.bf16 %v1649_v63, %v1649_v63 }
 0x256   : > { %1708 = vrot.lane.b32.xlu0 %v1665_v25, %s2184_s22 }
 0x25b   : > { %v997_v8 = vpop.permute.xlu1 %996  ;;  %v892_v7 = vpop.permute.xlu0 %891 }
 0x25c   : > { %v927_v15 = vadd.f32 %v892_v7, %v2832_v44 }
 0x25e   : > { %v1032_v26 = vadd.f32 %v997_v8, %v927_v15 }
 0x260   : > { %v1052_v9 = vadd.f32 %v2720_v52, %v1032_v26 }
 0x262   : > { %v1068_v32 = vmax.f32 %v1052_v9, 0.0 }
 0x263   : > { %v894_v20 = vpop.permute.xlu1 %893  ;;  %v1578_v39 = vpop.permute.xlu0 %1577 }
 0x264   : > { %v1084_v31 = vpack.c.bf16 %v1068_v32, %v1068_v32  ;;  %v928_v10 = vadd.f32 %v894_v20, %v2837_v3  ;;  %v896_v11 = vpop.permute.xlu2 %895  ;;  %v1613_v40 = vadd.f32 %v1578_v39, %v1509_v28 }
 0x265   : > { %v929_v35 = vadd.f32 %v896_v11, %v2881_v38 }
 0x266   : > { %v1033_v1 = vadd.f32 %v999_v12, %v928_v10  ;;  %1101 = vst.msk [vmem:[%s2736_s13 + $0x30] sm:$0xf] %vm1088_vm4, %v1084_v31  ;;  %v1634_v44 = vadd.f32 %v2910_v27, %v1613_v40 }
 0x268   : > { %v1053_v56 = vadd.f32 %v2720_v52, %v1033_v1  ;;  %v1650_v17 = vmax.f32 %v1634_v44, 0.0 }
 0x26a   : > { %v1069_v14 = vmax.f32 %v1053_v56, 0.0  ;;  %v1666_v24 = vpack.c.bf16 %v1650_v17, %v1650_v17 }
 0x26b   : > { %v1476_v34 = vpop.permute.xlu0 %1475  ;;  %v1580_v16 = vpop.permute.xlu1 %1579 }
 0x26c   : > { %v1085_v13 = vpack.c.bf16 %v1069_v14, %v1069_v14  ;;  %v1510_v51 = vadd.f32 %v1476_v34, %v2844_v54  ;;  %1710 = vrot.lane.b32.xlu1 %v1666_v24, %s2184_s22 }
 0x26d   : > { %v1480_v3 = vpop.permute.xlu2 %1479 }
 0x26e   : > { %1102 = vst.msk [vmem:[%s2736_s13 + $0x34] sm:$0xf] %vm1088_vm4, %v1085_v13  ;;  %v1614_v6 = vadd.f32 %v1580_v16, %v1510_v51  ;;  %v1512_v57 = vadd.f32 %v1480_v3, %v2892_v41 }
 0x270   : > { %v1635_v30 = vadd.f32 %v2910_v27, %v1614_v6 }
 0x272   : > { %v1651_v60 = vmax.f32 %v1635_v30, 0.0 }
 0x274   : > { %v1667_v62 = vpack.c.bf16 %v1651_v60, %v1651_v60 }
 0x275   : > { %v1582_v36 = vpop.permute.xlu2 %1581 }
 0x276   : > { %1712 = vrot.lane.b32.xlu2 %v1667_v62, %s2184_s22 }
 0x27b   : > { %v1001_v54 = vpop.permute.xlu0 %1000 }
 0x27c   : > { %v1034_v18 = vadd.f32 %v1001_v54, %v929_v35 }
 0x27d   : > { %v1478_v47 = vpop.permute.xlu1 %1477  ;;  %v1689_v50 = vpop.permute.xlu2 %1688 }
 0x27e   : > { %v1511_v21 = vadd.f32 %v1478_v47, %v2883_v46  ;;  %1736 = vst.msk [vmem:[%s2736_s13 + $0x4] sm:$0xf] %vm1734_vm5, %v1689_v50  ;;  %v1054_v61 = vadd.f32 %v2720_v52, %v1034_v18 }
 0x280   : > { %v1615_v19 = vadd.f32 %v1582_v36, %v1511_v21  ;;  %v1070_v55 = vmax.f32 %v1054_v61, 0.0 }
 0x282   : > { %v1636_v5 = vadd.f32 %v2910_v27, %v1615_v19  ;;  %v1086_v37 = vpack.c.bf16 %v1070_v55, %v1070_v55 }
 0x283   : > { %v898_v49 = vpop.permute.xlu0 %897 }
 0x284   : > { %v1652_v53 = vmax.f32 %v1636_v5, 0.0  ;;  %1103 = vst.msk [vmem:[%s2736_s13 + $0x38] sm:$0xf] %vm1088_vm4, %v1086_v37  ;;  %v930_v38 = vadd.f32 %v898_v49, %v2886_v42 }
 0x285   : > { %v1003_v59 = vpop.permute.xlu1 %1002  ;;  %v1695_v22 = vpop.permute.xlu2 %1694 }
 0x286   : > { %1739 = vst.msk [vmem:[%s2736_s13 + $0x10] sm:$0xf] %vm1734_vm5, %v1695_v22  ;;  %v1668_v46 = vpack.c.bf16 %v1652_v53, %v1652_v53  ;;  %v1035_v43 = vadd.f32 %v1003_v59, %v930_v38 }
 0x288   : > { %1714 = vrot.lane.b32.xlu0 %v1668_v46, %s2184_s22  ;;  %v1055_v2 = vadd.f32 %v2720_v52, %v1035_v43 }
 0x28a   : > { %v1071_v45 = vmax.f32 %v1055_v2, 0.0 }
 0x28b   : > { %v1584_v48 = vpop.permute.xlu0 %1583 }
 0x28c   : > { %v1087_v0 = vpack.c.bf16 %v1071_v45, %v1071_v45  ;;  %v1616_v42 = vadd.f32 %v1584_v48, %v1512_v57 }
 0x28d   : > { %v1687_v58 = vpop.permute.xlu1 %1686  ;;  %v1701_v23 = vpop.permute.xlu2 %1700 }
 0x28e   : > { %1735 = vst.msk [vmem:[%s2736_s13] sm:$0xf] %vm1734_vm5, %v1687_v58  ;;  %v1637_v33 = vadd.f32 %v2910_v27, %v1616_v42 }
 0x28f   : > { %1104 = vst.msk [vmem:[%s2736_s13 + $0x3c] sm:$0xf] %vm1088_vm4, %v1087_v0 }
 0x290   : > { %1742 = vst.msk [vmem:[%s2736_s13 + $0x1c] sm:$0xf] %vm1734_vm5, %v1701_v23  ;;  %v1653_v52 = vmax.f32 %v1637_v33, 0.0 }
 0x292   : > { %v1669_v41 = vpack.c.bf16 %v1653_v52, %v1653_v52 }
 0x293   : > { %v1691_v4 = vpop.permute.xlu0 %1690 }
 0x294   : > { %1737 = vst.msk [vmem:[%s2736_s13 + $0x8] sm:$0xf] %vm1734_vm5, %v1691_v4  ;;  %1716 = vrot.lane.b32.xlu1 %v1669_v41, %s2184_s22 }
 0x295   : > { %v1693_v29 = vpop.permute.xlu1 %1692 }
 0x296   : > { %1738 = vst.msk [vmem:[%s2736_s13 + $0xc] sm:$0xf] %vm1734_vm5, %v1693_v29 }
 0x29b   : > { %v1697_v63 = vpop.permute.xlu0 %1696 }
 0x29c   : > { %1740 = vst.msk [vmem:[%s2736_s13 + $0x14] sm:$0xf] %vm1734_vm5, %v1697_v63 }
 0x29d   : > { %v1699_v27 = vpop.permute.xlu1 %1698 }
 0x29e   : > { %1741 = vst.msk [vmem:[%s2736_s13 + $0x18] sm:$0xf] %vm1734_vm5, %v1699_v27 }
 0x2a3   : > { %v1703_v25 = vpop.permute.xlu0 %1702 }
 0x2a4   : > { %1743 = vst.msk [vmem:[%s2736_s13 + $0x20] sm:$0xf] %vm1734_vm5, %v1703_v25 }
 0x2a6   : > { %v1705_v8 = vpop.permute.xlu1 %1704  ;;  %v1707_v7 = vpop.permute.xlu2 %1706 }
 0x2a7   : > { %1744 = vst.msk [vmem:[%s2736_s13 + $0x24] sm:$0xf] %vm1734_vm5, %v1705_v8 }
 0x2a8   : > { %1745 = vst.msk [vmem:[%s2736_s13 + $0x28] sm:$0xf] %vm1734_vm5, %v1707_v7 }
 0x2c8   : > { %v1709_v15 = vpop.permute.xlu0 %1708 }
 0x2c9   : > { %1746 = vst.msk [vmem:[%s2736_s13 + $0x2c] sm:$0xf] %vm1734_vm5, %v1709_v15 }
 0x2d0   : > { %v1713_v12 = vpop.permute.xlu2 %1712 }
 0x2d1   : > { %1748 = vst.msk [vmem:[%s2736_s13 + $0x34] sm:$0xf] %vm1734_vm5, %v1713_v12 }
 0x2de   : > { %v1711_v26 = vpop.permute.xlu1 %1710 }
 0x2df   : > { %1747 = vst.msk [vmem:[%s2736_s13 + $0x30] sm:$0xf] %vm1734_vm5, %v1711_v26 }
 0x2fa   : > { %v1715_v9 = vpop.permute.xlu0 %1714 }
 0x2fb   : > { %1749 = vst.msk [vmem:[%s2736_s13 + $0x38] sm:$0xf] %vm1734_vm5, %v1715_v9 }
 0x306   : > { %v1717_v32 = vpop.permute.xlu1 %1716 }
 0x307   : > { %1750 = vst.msk [vmem:[%s2736_s13 + $0x3c] sm:$0xf] %vm1734_vm5, %v1717_v32 }
 0x308 PF: > { %s14_s19 = sadd.s32 1, %s2180_s19   ;;  %s3063_s15 = smov %s2172_s17 }
 0x309   : > { %p11_p9 = scmp.ge.s32.totalorder %s14_s19, 6   ;;  %s3064_s16 = smov %s2176_s18 }
 0x30a   : > { %s3065_s17 = smov %s3068_s20  ;;  %s3066_s18 = smov %s3072_s21 }
 0x30b   :  { %13 = sbr.rel (!%p11_p9) target bundleno = 3 (0x3), region = 71 }

</bundles_post_ra>
